<compile_context>
chip_gen: v7x
topology: tpu7x:2x2x1
jax: 0.10.0
libtpu: 0.0.40
codegen_flags: <defaults>
</compile_context>

<pallas_src>
import jax
import jax.numpy as jnp
import numpy as np
from jax.experimental import pallas as pl
from jax.experimental.pallas import tpu as pltpu

KH = KW = 3  # kernel size
PAD = 1
STRIDE = 1


def _conv_bn_silu_kernel(x_lo_ref, x_hi_ref, w_ref, shift_ref, o_ref,
                         xa_ref, p_ref):
    # x_lo_ref:  (1, tile_h, Wp, Cin)   body rows of the padded input slab
    # x_hi_ref:  (1, 8, Wp, Cin)        next 8 padded rows (first 2 = halo)
    # w_ref:     (KH*KW*Cin, Cout)      bf16 weights, BN scale pre-folded
    # shift_ref: (1, Cout)              f32 folded BN shift
    # o_ref:     (1, tile_h, W, Cout)   f32 output block
    # xa_ref:    (tile_h+2, Wp, Cin)    VMEM scratch: assembled padded rows
    # p_ref:     (tile_h*W, KH*KW*Cin)  VMEM scratch: im2col slab (bf16)
    tile_h = x_lo_ref.shape[1]
    Wp = x_lo_ref.shape[2]
    Cin = x_lo_ref.shape[3]
    W = o_ref.shape[2]
    Cout = o_ref.shape[3]

    # Assemble the (tile_h + 2) padded rows this tile needs: tile_h body rows
    # plus the 2-row bottom halo taken from the "next rows" block.
    xa_ref[0:tile_h] = x_lo_ref[0]
    xa_ref[tile_h:tile_h + 2] = x_hi_ref[0, 0:2]
    xa = xa_ref[...]  # (tile_h+2, Wp, Cin), bf16

    # im2col: pack the 9 taps into the contraction dim (K = 9*Cin) so the MXU
    # sees a single matmul instead of 9 K=Cin matmuls.
    for kh in range(KH):
        for kw in range(KW):
            tap = kh * KW + kw
            p_ref[:, tap * Cin:(tap + 1) * Cin] = (
                xa[kh:kh + tile_h, kw:kw + W, :].reshape(tile_h * W, Cin))

    # Single MXU matmul: bf16 operands, f32 accumulation.
    acc = jnp.dot(p_ref[...], w_ref[...], preferred_element_type=jnp.float32)

    # Fused BN (scale already folded into weights) + SiLU epilogue.
    y = acc + shift_ref[...]          # (tile_h*W, Cout) + (1, Cout)
    y = y * jax.nn.sigmoid(y)         # SiLU (sigmoid runs on the EUP slot)

    o_ref[0] = y.reshape(tile_h, W, Cout).astype(o_ref.dtype)


def _pick_tile_h(H, W, Cin, Cout):
    """Largest row-tile height (multiple of 8, dividing H) whose per-step
    working set stays within a conservative ~6 MiB budget (double-buffered
    blocks + scratches), keeping the pipeline in the large-tile regime while
    fitting comfortably inside v7x's 64 MiB VMEM (and v5e/v6e defaults)."""
    candidates = [t for t in range(8, H + 1, 8) if H % t == 0]
    if not candidates:
        # TODO(synk): support H not a multiple of 8 (pad rows + crop output).
        raise NotImplementedError("H must be a positive multiple of 8")
    budget = 6 * 1024 * 1024
    tile_h = candidates[0]
    for t in candidates:
        work = (2 * (t + 8) * (W + 2) * Cin * 2      # double-buffered inputs (bf16)
                + 2 * t * W * Cout * 4               # double-buffered output (f32)
                + (t + 2) * (W + 2) * Cin * 2        # assembled-rows scratch (bf16)
                + t * W * KH * KW * Cin * 2          # im2col slab scratch (bf16)
                + t * W * Cout * 4)                  # f32 accumulator
        if work > budget:
            break
        tile_h = t
        if t * W >= 2048:                            # MXU M-dim already large
            break
    return tile_h


def conv_bn_silu(x_nchw, weight_oihw, gamma, beta, running_mean, running_var,
                 eps=1e-5, tile_h=None):
    """PyTorch-equivalent forward of Conv(in,out,3,1,1,bias=False) + BN(eval) + SiLU.

    x_nchw:      (N, Cin, H, W) float32
    weight_oihw: (Cout, Cin, 3, 3) float32
    returns:     (N, Cout, H, W) float32
    """
    N, Cin, H, W = x_nchw.shape
    Cout = weight_oihw.shape[0]
    if H % 8 != 0:
        # TODO(synk): support H not a multiple of 8 (pad rows + crop output).
        raise NotImplementedError("H must be a multiple of 8")
    if tile_h is None:
        tile_h = _pick_tile_h(H, W, Cin, Cout)
    assert H % tile_h == 0 and tile_h % 8 == 0
    n_row_tiles = H // tile_h
    hi_blocks_per_tile = tile_h // 8
    Wp = W + 2 * PAD
    K = KH * KW * Cin

    # Fold BatchNorm (running statistics) into the conv weights (scale) and a
    # per-channel shift applied in the kernel epilogue.
    inv_std = 1.0 / jnp.sqrt(running_var + eps)
    scale = gamma * inv_std                                   # (Cout,)
    shift = (beta - running_mean * scale).reshape(1, Cout).astype(jnp.float32)

    # OIHW -> (KH, KW, Cin, Cout), fold BN scale, pack to (9*Cin, Cout) bf16.
    w_hwio = jnp.transpose(weight_oihw, (2, 3, 1, 0)) * scale[None, None, None, :]
    w_packed = w_hwio.reshape(K, Cout).astype(jnp.bfloat16)

    # NCHW -> NHWC (bf16), zero-pad: 1 top row + 7 bottom rows (so the 8-row
    # halo block of the last row tile stays in bounds), 1 column each side.
    x_nhwc = jnp.transpose(x_nchw, (0, 2, 3, 1)).astype(jnp.bfloat16)
    x_pad = jnp.pad(x_nhwc, ((0, 0), (PAD, 8 - PAD), (PAD, PAD), (0, 0)))
    # padded row p corresponds to original row p-1; padded rows >= H+1 are zeros.

    out_nhwc = pl.pallas_call(
        _conv_bn_silu_kernel,
        out_shape=jax.ShapeDtypeStruct((N, H, W, Cout), jnp.float32),
        grid_spec=pltpu.PrefetchScalarGridSpec(
            num_scalar_prefetch=0,
            grid=(N, n_row_tiles),
            in_specs=[
                # body rows of the padded input for this row tile
                pl.BlockSpec((1, tile_h, Wp, Cin), lambda n, t: (n, t, 0, 0)),
                # next 8 padded rows (bottom halo lives in the first 2)
                pl.BlockSpec((1, 8, Wp, Cin),
                             lambda n, t: (n, (t + 1) * hi_blocks_per_tile, 0, 0)),
                # full packed weights + BN shift, resident across the grid
                pl.BlockSpec((K, Cout), lambda n, t: (0, 0)),
                pl.BlockSpec((1, Cout), lambda n, t: (0, 0)),
            ],
            out_specs=pl.BlockSpec((1, tile_h, W, Cout),
                                   lambda n, t: (n, t, 0, 0)),
            scratch_shapes=[
                pltpu.VMEM((tile_h + 2, Wp, Cin), jnp.bfloat16),  # assembled rows
                pltpu.VMEM((tile_h * W, K), jnp.bfloat16),        # im2col slab
            ],
        ),
        compiler_params=pltpu.CompilerParams(
            dimension_semantics=("parallel", "parallel"),
            vmem_limit_bytes=48 * 1024 * 1024,
        ),
    )(x_pad, x_pad, w_packed, shift)

    # NHWC -> NCHW to match the PyTorch output layout.
    return jnp.transpose(out_nhwc, (0, 3, 1, 2))


def _reference(x_nchw, weight_oihw, gamma, beta, running_mean, running_var,
               eps=1e-5):
    """Pure-JAX f32 reference (lax conv) for correctness checking."""
    y = jax.lax.conv_general_dilated(
        x_nchw, weight_oihw,
        window_strides=(STRIDE, STRIDE),
        padding=((PAD, PAD), (PAD, PAD)),
        dimension_numbers=("NCHW", "OIHW", "NCHW"))
    scale = (gamma / jnp.sqrt(running_var + eps))[None, :, None, None]
    shift = (beta - running_mean * gamma / jnp.sqrt(running_var + eps)
             )[None, :, None, None]
    y = y * scale + shift
    return y * jax.nn.sigmoid(y)


if __name__ == "__main__":
    key = jax.random.PRNGKey(0)
    k_x, k_w, k_g, k_b, k_m, k_v = jax.random.split(key, 6)

    # Small shapes consistent with the module (NCHW input).
    N, Cin, Cout, H, W = 2, 4, 8, 16, 16

    x = jax.random.uniform(k_x, (N, Cin, H, W), dtype=jnp.float32)
    weight = jax.random.normal(k_w, (Cout, Cin, KH, KW), dtype=jnp.float32) * 0.1
    gamma = jax.random.uniform(k_g, (Cout,), dtype=jnp.float32, minval=0.5, maxval=1.5)
    beta = jax.random.normal(k_b, (Cout,), dtype=jnp.float32) * 0.1
    running_mean = jax.random.normal(k_m, (Cout,), dtype=jnp.float32) * 0.1
    running_var = jax.random.uniform(k_v, (Cout,), dtype=jnp.float32,
                                     minval=0.5, maxval=1.5)

    ref = _reference(x, weight, gamma, beta, running_mean, running_var)
    ref = jax.block_until_ready(ref)

    # Exercise both the multi-row-tile path (halo crossing interior tile
    # boundaries, tile_h=8 -> grid=(2,2)) and the auto-picked single-tile path.
    for th in (8, None):
        out = conv_bn_silu(x, weight, gamma, beta, running_mean, running_var,
                           tile_h=th)
        out = jax.block_until_ready(out)
        assert out.shape == (N, Cout, H, W)
        # bf16 matmul operands with f32 accumulation -> bf16-level tolerance.
        np.testing.assert_allclose(np.asarray(out), np.asarray(ref),
                                   rtol=2e-2, atol=2e-2)

    print("KERNEL_OK")
</pallas_src>

<mosaic_0001>
module attributes {stable_mosaic.version = 11 : i64} {
  func.func @_conv_bn_silu_kernel(%arg0: i32, %arg1: i32, %arg2: memref<1x8x18x4xbf16, #tpu.memory_space<vmem>>, %arg3: memref<1x8x18x4xbf16, #tpu.memory_space<vmem>>, %arg4: memref<36x8xbf16, #tpu.memory_space<vmem>>, %arg5: memref<1x8xf32, #tpu.memory_space<vmem>>, %arg6: memref<1x8x16x8xf32, #tpu.memory_space<vmem>>, %arg7: memref<10x18x4xbf16, #tpu.memory_space<vmem>>, %arg8: memref<128x36xbf16, #tpu.memory_space<vmem>>) attributes {dimension_semantics = [#tpu.dimension_semantics<parallel>, #tpu.dimension_semantics<parallel>], iteration_bounds = array<i64: 2, 2>, scalar_prefetch = 0 : i64, scratch_operands = 2 : i64, tpu.core_type = #tpu.core_type<tc>, window_params = [{transform_indices = @transform_0, window_bounds = array<i64: 1, 8, 18, 4>}, {transform_indices = @transform_1, window_bounds = array<i64: 1, 8, 18, 4>}, {pipeline_mode = #tpu.pipeline_mode<synchronous>, transform_indices = @transform_2, window_bounds = array<i64: 36, 8>}, {pipeline_mode = #tpu.pipeline_mode<synchronous>, transform_indices = @transform_3, window_bounds = array<i64: 1, 8>}, {transform_indices = @transform_4, window_bounds = array<i64: 1, 8, 16, 8>}]} {
    %c0 = arith.constant 0 : index
    %c0_0 = arith.constant 0 : index
    %c0_1 = arith.constant 0 : index
    %c0_2 = arith.constant 0 : index
    %0 = vector.load %arg2[%c0, %c0_0, %c0_1, %c0_2] : memref<1x8x18x4xbf16, #tpu.memory_space<vmem>>, vector<1x8x18x4xbf16>
    %1 = vector.shape_cast %0 : vector<1x8x18x4xbf16> to vector<8x18x4xbf16>
    %c0_3 = arith.constant 0 : index
    %c0_4 = arith.constant 0 : index
    %c0_5 = arith.constant 0 : index
    %2 = vector.load %arg7[%c0_3, %c0_4, %c0_5] : memref<10x18x4xbf16, #tpu.memory_space<vmem>>, vector<8x18x4xbf16>
    tpu.vector_store %arg7[%c0_3, %c0_4, %c0_5], %1 {strides = array<i32>} : memref<10x18x4xbf16, #tpu.memory_space<vmem>>, vector<8x18x4xbf16>,
    %c0_6 = arith.constant 0 : index
    %c0_7 = arith.constant 0 : index
    %c0_8 = arith.constant 0 : index
    %c0_9 = arith.constant 0 : index
    %3 = vector.load %arg3[%c0_6, %c0_7, %c0_8, %c0_9] : memref<1x8x18x4xbf16, #tpu.memory_space<vmem>>, vector<1x2x18x4xbf16>
    %4 = vector.shape_cast %3 : vector<1x2x18x4xbf16> to vector<2x18x4xbf16>
    %c8 = arith.constant 8 : index
    %c0_10 = arith.constant 0 : index
    %c0_11 = arith.constant 0 : index
    %5 = vector.load %arg7[%c8, %c0_10, %c0_11] : memref<10x18x4xbf16, #tpu.memory_space<vmem>>, vector<2x18x4xbf16>
    tpu.vector_store %arg7[%c8, %c0_10, %c0_11], %4 {strides = array<i32>} : memref<10x18x4xbf16, #tpu.memory_space<vmem>>, vector<2x18x4xbf16>,
    %c0_12 = arith.constant 0 : index
    %c0_13 = arith.constant 0 : index
    %c0_14 = arith.constant 0 : index
    %6 = vector.load %arg7[%c0_12, %c0_13, %c0_14] : memref<10x18x4xbf16, #tpu.memory_space<vmem>>, vector<10x18x4xbf16>
    %7 = vector.extract_strided_slice %6 {offsets = [0, 0, 0], sizes = [8, 16, 4], strides = [1, 1, 1]} : vector<10x18x4xbf16> to vector<8x16x4xbf16>
    %8 = vector.shape_cast %7 : vector<8x16x4xbf16> to vector<128x4xbf16>
    %c0_15 = arith.constant 0 : index
    %c0_16 = arith.constant 0 : index
    %9 = vector.load %arg8[%c0_15, %c0_16] : memref<128x36xbf16, #tpu.memory_space<vmem>>, vector<128x4xbf16>
    tpu.vector_store %arg8[%c0_15, %c0_16], %8 {strides = array<i32>} : memref<128x36xbf16, #tpu.memory_space<vmem>>, vector<128x4xbf16>,
    %10 = vector.extract_strided_slice %6 {offsets = [0, 1, 0], sizes = [8, 16, 4], strides = [1, 1, 1]} : vector<10x18x4xbf16> to vector<8x16x4xbf16>
    %11 = vector.shape_cast %10 : vector<8x16x4xbf16> to vector<128x4xbf16>
    %c0_17 = arith.constant 0 : index
    %c4 = arith.constant 4 : index
    %12 = vector.load %arg8[%c0_17, %c4] : memref<128x36xbf16, #tpu.memory_space<vmem>>, vector<128x4xbf16>
    tpu.vector_store %arg8[%c0_17, %c4], %11 {strides = array<i32>} : memref<128x36xbf16, #tpu.memory_space<vmem>>, vector<128x4xbf16>,
    %13 = vector.extract_strided_slice %6 {offsets = [0, 2, 0], sizes = [8, 16, 4], strides = [1, 1, 1]} : vector<10x18x4xbf16> to vector<8x16x4xbf16>
    %14 = vector.shape_cast %13 : vector<8x16x4xbf16> to vector<128x4xbf16>
    %c0_18 = arith.constant 0 : index
    %c8_19 = arith.constant 8 : index
    %15 = vector.load %arg8[%c0_18, %c8_19] : memref<128x36xbf16, #tpu.memory_space<vmem>>, vector<128x4xbf16>
    tpu.vector_store %arg8[%c0_18, %c8_19], %14 {strides = array<i32>} : memref<128x36xbf16, #tpu.memory_space<vmem>>, vector<128x4xbf16>,
    %16 = vector.extract_strided_slice %6 {offsets = [1, 0, 0], sizes = [8, 16, 4], strides = [1, 1, 1]} : vector<10x18x4xbf16> to vector<8x16x4xbf16>
    %17 = vector.shape_cast %16 : vector<8x16x4xbf16> to vector<128x4xbf16>
    %c0_20 = arith.constant 0 : index
    %c12 = arith.constant 12 : index
    %18 = vector.load %arg8[%c0_20, %c12] : memref<128x36xbf16, #tpu.memory_space<vmem>>, vector<128x4xbf16>
    tpu.vector_store %arg8[%c0_20, %c12], %17 {strides = array<i32>} : memref<128x36xbf16, #tpu.memory_space<vmem>>, vector<128x4xbf16>,
    %19 = vector.extract_strided_slice %6 {offsets = [1, 1, 0], sizes = [8, 16, 4], strides = [1, 1, 1]} : vector<10x18x4xbf16> to vector<8x16x4xbf16>
    %20 = vector.shape_cast %19 : vector<8x16x4xbf16> to vector<128x4xbf16>
    %c0_21 = arith.constant 0 : index
    %c16 = arith.constant 16 : index
    %21 = vector.load %arg8[%c0_21, %c16] : memref<128x36xbf16, #tpu.memory_space<vmem>>, vector<128x4xbf16>
    tpu.vector_store %arg8[%c0_21, %c16], %20 {strides = array<i32>} : memref<128x36xbf16, #tpu.memory_space<vmem>>, vector<128x4xbf16>,
    %22 = vector.extract_strided_slice %6 {offsets = [1, 2, 0], sizes = [8, 16, 4], strides = [1, 1, 1]} : vector<10x18x4xbf16> to vector<8x16x4xbf16>
    %23 = vector.shape_cast %22 : vector<8x16x4xbf16> to vector<128x4xbf16>
    %c0_22 = arith.constant 0 : index
    %c20 = arith.constant 20 : index
    %24 = vector.load %arg8[%c0_22, %c20] : memref<128x36xbf16, #tpu.memory_space<vmem>>, vector<128x4xbf16>
    tpu.vector_store %arg8[%c0_22, %c20], %23 {strides = array<i32>} : memref<128x36xbf16, #tpu.memory_space<vmem>>, vector<128x4xbf16>,
    %25 = vector.extract_strided_slice %6 {offsets = [2, 0, 0], sizes = [8, 16, 4], strides = [1, 1, 1]} : vector<10x18x4xbf16> to vector<8x16x4xbf16>
    %26 = vector.shape_cast %25 : vector<8x16x4xbf16> to vector<128x4xbf16>
    %c0_23 = arith.constant 0 : index
    %c24 = arith.constant 24 : index
    %27 = vector.load %arg8[%c0_23, %c24] : memref<128x36xbf16, #tpu.memory_space<vmem>>, vector<128x4xbf16>
    tpu.vector_store %arg8[%c0_23, %c24], %26 {strides = array<i32>} : memref<128x36xbf16, #tpu.memory_space<vmem>>, vector<128x4xbf16>,
    %28 = vector.extract_strided_slice %6 {offsets = [2, 1, 0], sizes = [8, 16, 4], strides = [1, 1, 1]} : vector<10x18x4xbf16> to vector<8x16x4xbf16>
    %29 = vector.shape_cast %28 : vector<8x16x4xbf16> to vector<128x4xbf16>
    %c0_24 = arith.constant 0 : index
    %c28 = arith.constant 28 : index
    %30 = vector.load %arg8[%c0_24, %c28] : memref<128x36xbf16, #tpu.memory_space<vmem>>, vector<128x4xbf16>
    tpu.vector_store %arg8[%c0_24, %c28], %29 {strides = array<i32>} : memref<128x36xbf16, #tpu.memory_space<vmem>>, vector<128x4xbf16>,
    %31 = vector.extract_strided_slice %6 {offsets = [2, 2, 0], sizes = [8, 16, 4], strides = [1, 1, 1]} : vector<10x18x4xbf16> to vector<8x16x4xbf16>
    %32 = vector.shape_cast %31 : vector<8x16x4xbf16> to vector<128x4xbf16>
    %c0_25 = arith.constant 0 : index
    %c32 = arith.constant 32 : index
    %33 = vector.load %arg8[%c0_25, %c32] : memref<128x36xbf16, #tpu.memory_space<vmem>>, vector<128x4xbf16>
    tpu.vector_store %arg8[%c0_25, %c32], %32 {strides = array<i32>} : memref<128x36xbf16, #tpu.memory_space<vmem>>, vector<128x4xbf16>,
    %c0_26 = arith.constant 0 : index
    %c0_27 = arith.constant 0 : index
    %34 = vector.load %arg8[%c0_26, %c0_27] : memref<128x36xbf16, #tpu.memory_space<vmem>>, vector<128x36xbf16>
    %c0_28 = arith.constant 0 : index
    %c0_29 = arith.constant 0 : index
    %35 = vector.load %arg4[%c0_28, %c0_29] : memref<36x8xbf16, #tpu.memory_space<vmem>>, vector<36x8xbf16>
    %cst = arith.constant dense<0.000000e+00> : vector<128x8xf32>
    %36 = tpu.matmul %34, %35, %cst {dimension_numbers = #tpu.dot_dimension_numbers<[1], [0], [0], [1], [0, 0, 1, 1], [], []>} : vector<128x36xbf16>, vector<36x8xbf16>, vector<128x8xf32> -> vector<128x8xf32>
    %c0_30 = arith.constant 0 : index
    %c0_31 = arith.constant 0 : index
    %37 = vector.load %arg5[%c0_30, %c0_31] : memref<1x8xf32, #tpu.memory_space<vmem>>, vector<1x8xf32>
    %38 = vector.broadcast %37 : vector<1x8xf32> to vector<128x8xf32>
    %39 = arith.addf %36, %38 : vector<128x8xf32>
    %40 = arith.negf %39 : vector<128x8xf32>
    %41 = math.exp %40 : vector<128x8xf32>
    %cst_32 = arith.constant 1.000000e+00 : f32
    %42 = vector.broadcast %cst_32 : f32 to vector<128x8xf32>
    %43 = arith.addf %42, %41 : vector<128x8xf32>
    %44 = arith.divf %42, %43 : vector<128x8xf32>
    %45 = arith.mulf %39, %44 : vector<128x8xf32>
    %46 = vector.shape_cast %45 : vector<128x8xf32> to vector<8x16x8xf32>
    %c0_33 = arith.constant 0 : index
    %c0_34 = arith.constant 0 : index
    %c0_35 = arith.constant 0 : index
    %c0_36 = arith.constant 0 : index
    %47 = vector.load %arg6[%c0_33, %c0_34, %c0_35, %c0_36] : memref<1x8x16x8xf32, #tpu.memory_space<vmem>>, vector<1x8x16x8xf32>
    %48 = vector.shape_cast %47 : vector<1x8x16x8xf32> to vector<8x16x8xf32>
    %49 = vector.shape_cast %46 : vector<8x16x8xf32> to vector<1x8x16x8xf32>
    tpu.vector_store %arg6[%c0_33, %c0_34, %c0_35, %c0_36], %49 {strides = array<i32>} : memref<1x8x16x8xf32, #tpu.memory_space<vmem>>, vector<1x8x16x8xf32>,
    return
  }
  func.func @transform_0(%arg0: i32, %arg1: i32) -> (i32, i32, i32, i32) {
    %c0_i32 = arith.constant 0 : i32
    %c0_i32_0 = arith.constant 0 : i32
    %c0_i32_1 = arith.constant 0 : i32
    return %arg0, %arg1, %c0_i32, %c0_i32_0 : i32, i32, i32, i32
  }
  func.func @transform_1(%arg0: i32, %arg1: i32) -> (i32, i32, i32, i32) {
    %c1_i32 = arith.constant 1 : i32
    %0 = arith.addi %arg1, %c1_i32 : i32
    %c1_i32_0 = arith.constant 1 : i32
    %1 = arith.muli %0, %c1_i32_0 : i32
    %c0_i32 = arith.constant 0 : i32
    %c0_i32_1 = arith.constant 0 : i32
    %c0_i32_2 = arith.constant 0 : i32
    return %arg0, %1, %c0_i32, %c0_i32_1 : i32, i32, i32, i32
  }
  func.func @transform_2(%arg0: i32, %arg1: i32) -> (i32, i32) {
    %c0_i32 = arith.constant 0 : i32
    %c0_i32_0 = arith.constant 0 : i32
    %c0_i32_1 = arith.constant 0 : i32
    return %c0_i32, %c0_i32_0 : i32, i32
  }
  func.func @transform_3(%arg0: i32, %arg1: i32) -> (i32, i32) {
    %c0_i32 = arith.constant 0 : i32
    %c0_i32_0 = arith.constant 0 : i32
    %c0_i32_1 = arith.constant 0 : i32
    return %c0_i32, %c0_i32_0 : i32, i32
  }
  func.func @transform_4(%arg0: i32, %arg1: i32) -> (i32, i32, i32, i32) {
    %c0_i32 = arith.constant 0 : i32
    %c0_i32_0 = arith.constant 0 : i32
    %c0_i32_1 = arith.constant 0 : i32
    return %arg0, %arg1, %c0_i32, %c0_i32_0 : i32, i32, i32, i32
  }
}

</mosaic_0001>

<bundles_post_ra>
// kernel: tpu_custom_call.1
= control target key start
LH: loop header
LB: loop body
LE: loop exit
PB: predicated region body
PF: predicated region fallthrough
CT: control target
= control target key end

     0   :  { %s1834_s15 = smov 0   ;;  %s1836_s16 = smov 0   ;;  %s2519_s0 = inlined_call_operand.vmem [shape: bf16[2,24,18,4], index: 0, kind: input, shape index: {}]   ;;  %s2520_s1 = inlined_call_operand.vmem [shape: bf16[2,24,18,4], index: 1, kind: input, shape index: {}]   ;;  %s2521_s2 = inlined_call_operand.vmem [shape: bf16[36,8], index: 2, kind: input, shape index: {}]   ;;  %s2522_s3 = inlined_call_operand.vmem [shape: f32[1,8], index: 3, kind: input, shape index: {}]   ;;  %s2523_s4 = inlined_call_operand.vmem [shape: f32[2,16,16,8], index: 4, kind: output, shape index: {}]  }
   0x1   :  { %s1838_s17 = smov 0   ;;  %s1840_s18 = smov 0  }
   0x2   :  { %s1842_s19 = smov 0  }
   0x3 LB: > { %s23_s20 = sadd.s32 1, %s1791_s17  ;;  %s26_s21 = sadd.s32 1, %s1795_s18  ;;  %s1799_s19 = sphi %s1842_s19, %s14_s19   ;;  %s1795_s18 = sphi %s1840_s18, %s2532_s18   ;;  %s1791_s17 = sphi %s1838_s17, %s2531_s17   ;;  %s1787_s16 = sphi %s1836_s16, %s2530_s16   ;;  %s1783_s15 = sphi %s1834_s15, %s2529_s15  }
   0x4   : > { %p24_p0 = scmp.ge.s32.totalorder %s23_s20, 2  ;;  %p1513_p1 = scmp.ge.s32.totalorder %s1799_s19, 1 }
   0x5   : > { %p206_p2 = scmp.lt.s32.totalorder %s1799_s19, 5 }
   0x6   : > { %s2534_s20 = smov (%p24_p0, %s23_s20), 0  ;;  %s2536_s21 = smov (!%p24_p0, %s26_s21), %s1795_s18 }
   0x7   : > { %p207_p3 = pnand %p1513_p1, %p206_p2  ;;  %p28_p4 = scmp.ge.s32.totalorder %s2536_s21, 2 }
   0x8   : > { %s1864_s22 = sshll.u32 (!%p207_p3), %s1783_s15, 3  ;;  %p254_p5 = scmp.lt.s32.totalorder (!%p207_p3), %s1787_s16, 1  ;;  %vm313_vm0 = vcmask (!%p207_p3), 27648   ;;  %vm316_vm1 = vcmask (!%p207_p3), 24576   ;;  %vm430_vm2 = vcmask (!%p207_p3), 31744   ;;  %vm699_vm3 = vcmask (!%p207_p3), 1042432  }
   0x9   : > { %s2538_s21 = smov (%p28_p4, %s2536_s21), 0  ;;  %210 = sbr.rel (%p207_p3) target bundleno = 549 (0x225), region = 36 }
   0xa   : > { %p256_p6 = scmp.lt.s32.totalorder (!%p207_p3), %s1864_s22, 23  ;;  %vm700_vm4 = vcmask (!%p207_p3), 1046532   ;;  %vm439_vm5 = vsmask.f32 (!%p207_p3), 3328  ;;  %vm440_vm6 = vsmask.f32 (!%p207_p3), 7440 }
   0xb   : > { %s1593_s5 = sadd.s32 (!%p207_p3), 8, %s1864_s22  ;;  %s1801_s7 = smov (!%p207_p3), 12   ;;  %vm1996_vm7 = vmor (!%p207_p3), %vm699_vm3, %vm700_vm4  ;;  %vm1159_vm9 = vcmask (!%p207_p3), 1041408   ;;  %vm682_vm10 = vcmask (!%p207_p3), 64544   ;;  %vm806_vm11 = vcmask (!%p207_p3), 97344   ;;  %vm844_vm12 = vcmask (!%p207_p3), 130144  }
   0xc   : > { %p1949_p7 = scmp.lt.s32.totalorder (!%p207_p3), %s1593_s5, 23  ;;  %vm2050_vm8 = vmor (!%p207_p3), %vm439_vm5, %vm440_vm6  ;;  %s1802_s14 = smov (!%p207_p3), 8   ;;  %vm904_vm13 = vcmask (!%p207_p3), 162944   ;;  %vm948_vm14 = vcmask (!%p207_p3), 195744   ;;  %vm986_vm15 = vcmask (!%p207_p3), 228544   ;;  %vm1372_vm3 = vcmask (!%p207_p3), 64512  }
   0xd   : > { %s1803_s15 = smov (!%p207_p3), 4   ;;  %p280_p8 = scmp.lt.s32.totalorder (!%p207_p3), %s1864_s22, 15 }
  0x10   : > { %s2540_s16 = smov (!%p254_p5, %s1787_s16), 1  ;;  %s2542_s5 = smov (!%p1949_p7, %s1593_s5), 23 }
  0x11   : > { %s257_s23 = scalar_select %p256_p6, %s1864_s22, 23 }
  0x12   : > { %s1636_s24 = smul.u32 72, %s2540_s16  ;;  %s2544_s22 = smov (!%p280_p8, %s1864_s22), 15 }
  0x13   : > { %s1635_s25 = smul.u32 3, %s257_s23  ;;  %s1804_s23 = smov 16  }
  0x14   : > { %s1637_s8 = smul.u32 3, %s2542_s5  ;;  %s1808_s5 = smov 32  }
  0x15   : > { %s260_s26 = sadd.s32 %s1636_s24, %s1635_s25  ;;  %s1806_s25 = smov 24  }
  0x16   : > { %s1515_s27 = sshll.u32 %s260_s26, 2  ;;  %s272_s9 = sadd.s32 %s1637_s8, %s1636_s24 }
  0x17   : > { %s1876_s30 = scalar_lea.vmem %s2519_s0, %s1515_s27  ;;  %s1517_s10 = sshll.u32 %s272_s9, 2 }
  0x18   : > { %v304_v0 = vld [vmem:[%s1876_s30 + $0x3c] sm:$0xf]  ;;  %v305_v1 = vld [vmem:[%s1876_s30 + $0x40] sm:$0xf]  ;;  %v292_v2 = vld [vmem:[%s1876_s30 + $0xc] sm:$0xf]  ;;  %s2063_s13 = scalar_lea.vmem %s2520_s1, %s1517_s10 }
  0x19   : > { %330 = vst.msk [vmem:[#allocation2 + $0x3c] sm:$0xf] %vm313_vm0, %v304_v0  ;;  %331 = vst.msk [vmem:[#allocation2 + $0x40] sm:$0xf] %vm313_vm0, %v305_v1  ;;  %v293_v3 = vld [vmem:[%s1876_s30 + $0x10] sm:$0xf] }
  0x1a   : > { %318 = vst.msk [vmem:[#allocation2 + $0xc] sm:$0xf] %vm313_vm0, %v292_v2  ;;  %v307_v4 = vld [vmem:[%s1876_s30 + $0x48] sm:$0xf]  ;;  %v308_v5 = vld [vmem:[%s1876_s30 + $0x4c] sm:$0xf] }
  0x1b   : > { %319 = vst.msk [vmem:[#allocation2 + $0x10] sm:$0xf] %vm313_vm0, %v293_v3  ;;  %333 = vst.msk [vmem:[#allocation2 + $0x48] sm:$0xf] %vm313_vm0, %v307_v4  ;;  %v295_v6 = vld [vmem:[%s1876_s30 + $0x18] sm:$0xf] }
  0x1c   : > { %334 = vst.msk [vmem:[#allocation2 + $0x4c] sm:$0xf] %vm313_vm0, %v308_v5  ;;  %v296_v7 = vld [vmem:[%s1876_s30 + $0x1c] sm:$0xf]  ;;  %v301_v8 = vld [vmem:[%s1876_s30 + $0x30] sm:$0xf] }
  0x1d   : > { %321 = vst.msk [vmem:[#allocation2 + $0x18] sm:$0xf] %vm313_vm0, %v295_v6  ;;  %322 = vst.msk [vmem:[#allocation2 + $0x1c] sm:$0xf] %vm313_vm0, %v296_v7  ;;  %v302_v9 = vld [vmem:[%s1876_s30 + $0x34] sm:$0xf] }
  0x1e   : > { %v303_v10 = vld [vmem:[%s1876_s30 + $0x38] sm:$0x1]  ;;  %327 = vst.msk [vmem:[#allocation2 + $0x30] sm:$0xf] %vm313_vm0, %v301_v8  ;;  %v289_v11 = vld [vmem:[%s1876_s30] sm:$0xf] }
  0x1f   : > { %328 = vst.msk [vmem:[#allocation2 + $0x34] sm:$0xf] %vm313_vm0, %v302_v9  ;;  %v290_v12 = vld [vmem:[%s1876_s30 + $0x4] sm:$0xf]  ;;  %v291_v13 = vld [vmem:[%s1876_s30 + $0x8] sm:$0x1] }
  0x20   : > { %329 = vst.msk [vmem:[#allocation2 + $0x38] sm:$0x1] %vm316_vm1, %v303_v10  ;;  %v306_v14 = vld [vmem:[%s1876_s30 + $0x44] sm:$0x1]  ;;  %317 = vst.msk [vmem:[#allocation2 + $0x8] sm:$0x1] %vm316_vm1, %v291_v13 }
  0x21   : > { %314 = vst.msk [vmem:[#allocation2] sm:$0xf] %vm313_vm0, %v289_v11  ;;  %315 = vst.msk [vmem:[#allocation2 + $0x4] sm:$0xf] %vm313_vm0, %v290_v12  ;;  %v294_v15 = vld [vmem:[%s1876_s30 + $0x14] sm:$0x1] }
  0x22   : > { %332 = vst.msk [vmem:[#allocation2 + $0x44] sm:$0x1] %vm316_vm1, %v306_v14  ;;  %v309_v16 = vld [vmem:[%s1876_s30 + $0x50] sm:$0x1]  ;;  %v297_v17 = vld [vmem:[%s1876_s30 + $0x20] sm:$0x1] }
  0x23   : > { %320 = vst.msk [vmem:[#allocation2 + $0x14] sm:$0x1] %vm316_vm1, %v294_v15  ;;  %335 = vst.msk [vmem:[#allocation2 + $0x50] sm:$0x1] %vm316_vm1, %v309_v16  ;;  %v310_v18 = vld [vmem:[%s1876_s30 + $0x54] sm:$0xf] }
  0x24   : > { %323 = vst.msk [vmem:[#allocation2 + $0x20] sm:$0x1] %vm316_vm1, %v297_v17  ;;  %v311_v19 = vld [vmem:[%s1876_s30 + $0x58] sm:$0xf]  ;;  %v298_v20 = vld [vmem:[%s1876_s30 + $0x24] sm:$0xf] }
  0x25   : > { %336 = vst.msk [vmem:[#allocation2 + $0x54] sm:$0xf] %vm313_vm0, %v310_v18  ;;  %337 = vst.msk [vmem:[#allocation2 + $0x58] sm:$0xf] %vm313_vm0, %v311_v19  ;;  %v299_v21 = vld [vmem:[%s1876_s30 + $0x28] sm:$0xf] }
  0x26   : > { %324 = vst.msk [vmem:[#allocation2 + $0x24] sm:$0xf] %vm313_vm0, %v298_v20  ;;  %v312_v22 = vld [vmem:[%s1876_s30 + $0x5c] sm:$0x1]  ;;  %v300_v23 = vld [vmem:[%s1876_s30 + $0x2c] sm:$0x1] }
  0x27   : > { %v1923_v24 = vld [vmem:[#allocation2 + $0x3c] sm:$0xf]  ;;  %v1925_v25 = vld [vmem:[#allocation2 + $0x40] sm:$0xf]  ;;  %v1927_v26 = vld [vmem:[#allocation2 + $0xc] sm:$0xf] }
  0x28   : > { %325 = vst.msk [vmem:[#allocation2 + $0x28] sm:$0xf] %vm313_vm0, %v299_v21  ;;  %v1934_v27 = vcombine.low %v1923_v24, %v1925_v25  ;;  %v563_v28 = vshrl.u32 %v1923_v24, 16  ;;  %v566_v29 = vshll.u32 %v1923_v24, 16  ;;  %v576_v30 = vshrl.u32 %v1925_v25, 16  ;;  %s1805_s24 = smov 20  }
  0x29   : > { %338 = vst.msk [vmem:[#allocation2 + $0x5c] sm:$0x1] %vm316_vm1, %v312_v22  ;;  %326 = vst.msk [vmem:[#allocation2 + $0x2c] sm:$0x1] %vm316_vm1, %v300_v23  ;;  %v1939_v31 = vld [vmem:[#allocation2 + $0x10] sm:$0xf] }
  0x2a   : > { %v1523_v32 = vcombine.low %v1927_v26, %v1939_v31  ;;  %v467_v33 = vshrl.u32 %v1927_v26, 16  ;;  %v470_v34 = vshll.u32 %v1927_v26, 16  ;;  %v476_v35 = vshll.u32 %v1939_v31, 16  ;;  %v1947_v36 = vld [vmem:[#allocation2 + $0x48] sm:$0xf]  ;;  %828 = vrot.lane.b32.xlu1 %v1934_v27, %s1801_s7  ;;  %436 = vst.msk [vmem:[#allocation3 + $0x28] sm:$0xff] %vm430_vm2, %v1934_v27 }
  0x2b   : > { %v480_v37 = vshrl.u32 %v1939_v31, 16  ;;  %v1958_v38 = vld [vmem:[#allocation2 + $0x4c] sm:$0xf]  ;;  %v587_v39 = vshrl.u32 %v1947_v36, 16  ;;  %v590_v40 = vshll.u32 %v1947_v36, 16  ;;  %v1543_v41 = vrot.slane %v1923_v24, 9 }
  0x2c   : > { %v469_v42 = vrot.slane %v467_v33, 4  ;;  %v472_v43 = vrot.slane %v470_v34, 5  ;;  %820 = vrot.lane.b32.xlu0 %v1523_v32, %s1801_s7  ;;  %432 = vst.msk [vmem:[#allocation3 + $0x8] sm:$0xff] %vm430_vm2, %v1523_v32  ;;  %v1967_v44 = vcombine.low %v1947_v36, %v1958_v38  ;;  %v600_v45 = vshrl.u32 %v1958_v38, 16  ;;  %v1970_v46 = vld [vmem:[#allocation2 + $0x18] sm:$0xf] }
  0x2d   : > { %v1976_v47 = vrot.slane %v480_v37, 4  ;;  %v1978_v48 = vld [vmem:[#allocation2 + $0x1c] sm:$0xf]  ;;  %v491_v49 = vshrl.u32 %v1970_v46, 16  ;;  %v494_v50 = vshll.u32 %v1970_v46, 16  ;;  %v739_v51 = vrot.slane %v1925_v25, 5 }
  0x2e   : > { %437 = vst.msk [vmem:[#allocation3 + $0x30] sm:$0xff] %vm430_vm2, %v1967_v44  ;;  %v1987_v52 = vcombine.low %v1970_v46, %v1978_v48  ;;  %v504_v53 = vshrl.u32 %v1978_v48, 16  ;;  %v1990_v54 = vld [vmem:[#allocation2 + $0x30] sm:$0xf]  ;;  %v1992_v55 = vld [vmem:[#allocation2 + $0x34] sm:$0xf]  ;;  %v473_v58 = vor.u32 %v472_v43, %v469_v42  ;;  %830 = vrot.lane.b32.xlu1 %v1967_v44, %s1801_s7 }
  0x2f   : > { %v1539_v57 = vrot.slane %v1927_v26, 9  ;;  %v2003_v59 = vld [vmem:[#allocation2 + $0x38] sm:$0x1]  ;;  %v1542_v60 = vrot.slane %v1990_v54, 9  ;;  %v732_v61 = vrot.slane %v1992_v55, 5  ;;  %v2011_v63 = vcombine.low %v1990_v54, %v1992_v55  ;;  %s1807_s26 = smov 28  }
  0x30   : > { %v2007_v62 = vld [vmem:[#allocation2] sm:$0xf]  ;;  %822 = vrot.lane.b32.xlu0 %v1987_v52, %s1801_s7  ;;  %433 = vst.msk [vmem:[#allocation3 + $0x10] sm:$0xff] %vm430_vm2, %v1987_v52  ;;  %v735_v0 = vrot.slane %v2003_v59, 5  ;;  %v2018_v1 = vld [vmem:[#allocation2 + $0x4] sm:$0xf]  ;;  %v740_v4 = vsel %vm1996_vm7, %v1543_v41, %v739_v51 }
  0x31   : > { %v2020_v2 = vld [vmem:[#allocation2 + $0x8] sm:$0x1]  ;;  %v1538_v3 = vrot.slane %v2007_v62, 9  ;;  %v733_v5 = vsel %vm1996_vm7, %v1542_v60, %v732_v61  ;;  %v734_v6 = vrot.slane %v732_v61, 4  ;;  %v704_v7 = vrot.slane %v2018_v1, 5  ;;  %435 = vst.msk [vmem:[#allocation3 + $0x20] sm:$0xff] %vm430_vm2, %v2011_v63 }
  0x32   : > { %v707_v8 = vrot.slane %v2020_v2, 5  ;;  %v2029_v9 = vld [vmem:[#allocation2 + $0x44] sm:$0x1]  ;;  %v741_v10 = vrot.slane %v739_v51, 4  ;;  %v357_v12 = vld [vmem:[#allocation2 + $0x14] sm:$0x1] }
  0x33   : > { %v742_v11 = vrot.slane %v2029_v9, 5  ;;  %v711_v13 = vrot.slane %v1939_v31, 5  ;;  %v474_v14 = vrot.slane %v473_v58, 4  ;;  %v736_v15 = vsel %vm1996_vm7, %v734_v6, %v735_v0  ;;  %v339_v58 = vld [vmem:[%s2063_s13] sm:$0xf]  ;;  %s1519_s10 = sshll.u32 %s2544_s22, 1 }
  0x34   : > { %v705_v16 = vsel %vm1996_vm7, %v1538_v3, %v704_v7  ;;  %v706_v17 = vrot.slane %v704_v7, 4  ;;  %v714_v18 = vrot.slane %v357_v12, 5  ;;  %v2042_v19 = vcombine.low %v733_v5, %v736_v15  ;;  %v340_v60 = vld [vmem:[%s2063_s13 + $0x4] sm:$0xf]  ;;  %346 = vst.msk [vmem:[#allocation2 + $0x60] sm:$0xf] %vm313_vm0, %v339_v58 }
  0x35   : > { %v743_v20 = vsel %vm1996_vm7, %v741_v10, %v742_v11  ;;  %v712_v21 = vsel %vm1996_vm7, %v1539_v57, %v711_v13  ;;  %v713_v22 = vrot.slane %v711_v13, 4  ;;  %v478_v33 = vrot.slane %v476_v35, 5  ;;  %347 = vst.msk [vmem:[#allocation2 + $0x64] sm:$0xf] %vm313_vm0, %v340_v60  ;;  %v341_v5 = vld [vmem:[%s2063_s13 + $0x8] sm:$0x1] }
  0x36   : > { %v708_v26 = vsel %vm1996_vm7, %v706_v17, %v707_v8  ;;  %v2056_v32 = vcombine.low %v740_v4, %v743_v20  ;;  %v486_v34 = vshll.u32 %v357_v12, 16  ;;  %790 = vrot.lane.b32.xlu1 %v2042_v19, %s1802_s14  ;;  %v443_v31 = vshrl.u32 %v2007_v62, 16  ;;  %348 = vst.msk [vmem:[#allocation2 + $0x68] sm:$0x1] %vm316_vm1, %v341_v5  ;;  %v342_v10 = vld [vmem:[%s2063_s13 + $0xc] sm:$0xf] }
  0x37   : > { %v1546_v37 = vcombine.low %v705_v16, %v708_v26  ;;  %v715_v41 = vsel %vm1996_vm7, %v713_v22, %v714_v18  ;;  %v446_v35 = vshll.u32 %v2007_v62, 16  ;;  %v479_v43 = vsel %vm2050_vm8, %v474_v14, %v478_v33  ;;  %v343_v15 = vld [vmem:[%s2063_s13 + $0x10] sm:$0xf]  ;;  %349 = vst.msk [vmem:[#allocation2 + $0x6c] sm:$0xf] %vm313_vm0, %v342_v10  ;;  %s1520_s11 = sshll.u32 %s2540_s16, 5 }
  0x38   : > { %v2071_v42 = vcombine.low %v712_v21, %v715_v41  ;;  %v483_v51 = vor.u32 %v1976_v47, %v478_v33  ;;  %v488_v57 = vrot.slane %v486_v34, 5  ;;  %v445_v61 = vrot.slane %v443_v31, 4  ;;  %350 = vst.msk [vmem:[#allocation2 + $0x70] sm:$0xf] %vm313_vm0, %v343_v15  ;;  %v344_v16 = vld [vmem:[%s2063_s13 + $0x14] sm:$0x1]  ;;  %s284_s12 = sadd.s32 %s1520_s11, %s1519_s10 }
  0x39   : > { %782 = vrot.lane.b32.xlu0 %v1546_v37, %s1802_s14  ;;  %v448_v0 = vrot.slane %v446_v35, 5  ;;  %v452_v3 = vshll.u32 %v2018_v1, 16  ;;  %v456_v4 = vshrl.u32 %v2018_v1, 16  ;;  %v462_v47 = vshll.u32 %v2020_v2, 16  ;;  %351 = vst.msk [vmem:[#allocation2 + $0x74] sm:$0x1] %vm316_vm1, %v344_v16 }
  0x3a   : > { %v484_v6 = vrot.slane %v483_v51, 4  ;;  %v565_v7 = vrot.slane %v563_v28, 4  ;;  %v568_v8 = vrot.slane %v566_v29, 5  ;;  %792 = vrot.lane.b32.xlu1 %v2056_v32, %s1802_s14  ;;  %v572_v14 = vshll.u32 %v1925_v25, 16  ;;  %s1521_s13 = sshll.u32 %s284_s12, 3 }
  0x3b   : > { %v449_v11 = vor.u32 %v448_v0, %v445_v61  ;;  %v454_v12 = vrot.slane %v452_v3, 5  ;;  %v458_v13 = vrot.slane %v456_v4, 4  ;;  %v464_v24 = vrot.slane %v462_v47, 5  ;;  %v372_v3 = vld [vmem:[#allocation2 + $0x50] sm:$0x1] }
  0x3c   : > { %v489_v28 = vsel %vm2050_vm8, %v484_v6, %v488_v57  ;;  %v569_v2 = vor.u32 %v568_v8, %v565_v7  ;;  %v578_v29 = vrot.slane %v576_v30, 4  ;;  %v574_v21 = vrot.slane %v572_v14, 5  ;;  %v2133_v14 = vld [vmem:[#allocation2 + $0x20] sm:$0x1] }
  0x3d   : > { %784 = vrot.lane.b32.xlu0 %v2071_v42, %s1802_s14  ;;  %v2104_v17 = vcombine.low %v479_v43, %v489_v28  ;;  %v450_v18 = vrot.slane %v449_v11, 4  ;;  %v459_v20 = vor.u32 %v458_v13, %v454_v12  ;;  %v582_v26 = vshll.u32 %v2029_v9, 16 }
  0x3e   : > { %v570_v22 = vrot.slane %v569_v2, 4  ;;  %v539_v33 = vshrl.u32 %v1990_v54, 16  ;;  %v542_v25 = vshll.u32 %v1990_v54, 16  ;;  %v579_v37 = vor.u32 %v578_v29, %v574_v21 }
  0x3f   : > { %660 = vrot.lane.b32.xlu1 %v2104_v17, %s1803_s15  ;;  %v455_v30 = vsel %vm2050_vm8, %v450_v18, %v454_v12  ;;  %v460_v34 = vrot.slane %v459_v20, 4  ;;  %v548_v41 = vshll.u32 %v1992_v55, 16  ;;  %v584_v35 = vrot.slane %v582_v26, 5 }
  0x40   : > { %v575_v31 = vsel %vm2050_vm8, %v570_v22, %v574_v21  ;;  %v541_v9 = vrot.slane %v539_v33, 4  ;;  %v544_v43 = vrot.slane %v542_v25, 5  ;;  %v580_v51 = vrot.slane %v579_v37, 4  ;;  %v2156_v37 = vld [vmem:[#allocation2 + $0x54] sm:$0xf] }
  0x41   : > { %v465_v54 = vsel %vm2050_vm8, %v460_v34, %v464_v24  ;;  %v550_v57 = vrot.slane %v548_v41, 5  ;;  %v552_v58 = vshrl.u32 %v1992_v55, 16  ;;  %v558_v0 = vshll.u32 %v2003_v59, 16  ;;  %v2158_v41 = vld [vmem:[#allocation2 + $0x58] sm:$0xf] }
  0x42   : > { %v1530_v60 = vcombine.low %v455_v30, %v465_v54  ;;  %v545_v61 = vor.u32 %v544_v43, %v541_v9  ;;  %v589_v4 = vrot.slane %v587_v39, 4  ;;  %v585_v5 = vsel %vm2050_vm8, %v580_v51, %v584_v35 }
  0x43   : > { %v554_v6 = vrot.slane %v552_v58, 4  ;;  %v592_v47 = vrot.slane %v590_v40, 5  ;;  %v596_v7 = vshll.u32 %v1958_v38, 16  ;;  %v2129_v55 = vcombine.low %v575_v31, %v585_v5 }
  0x44   : > { %658 = vrot.lane.b32.xlu0 %v1530_v60, %s1803_s15  ;;  %v546_v8 = vrot.slane %v545_v61, 4  ;;  %v560_v10 = vrot.slane %v558_v0, 5  ;;  %v602_v59 = vrot.slane %v600_v45, 4  ;;  %v606_v13 = vshll.u32 %v372_v3, 16  ;;  %v2174_v60 = vld [vmem:[#allocation2 + $0x24] sm:$0xf] }
  0x45   : > { %v555_v11 = vor.u32 %v554_v6, %v550_v57  ;;  %v593_v39 = vor.u32 %v592_v47, %v589_v4  ;;  %v598_v12 = vrot.slane %v596_v7, 5  ;;  %668 = vrot.lane.b32.xlu1 %v2129_v55, %s1803_s15  ;;  %v493_v15 = vrot.slane %v491_v49, 4 }
  0x46   : > { %v551_v40 = vsel %vm2050_vm8, %v546_v8, %v550_v57  ;;  %v496_v28 = vrot.slane %v494_v50, 5  ;;  %v500_v45 = vshll.u32 %v1978_v48, 16  ;;  %v608_v16 = vrot.slane %v606_v13, 5 }
  0x47   : > { %v556_v24 = vrot.slane %v555_v11, 4  ;;  %v594_v2 = vrot.slane %v593_v39, 4  ;;  %v603_v29 = vor.u32 %v602_v59, %v598_v12  ;;  %v506_v21 = vrot.slane %v504_v53, 4 }
  0x48   : > { %v497_v18 = vor.u32 %v496_v28, %v493_v15  ;;  %v502_v20 = vrot.slane %v500_v45, 5  ;;  %v510_v22 = vshll.u32 %v2133_v14, 16  ;;  %v1544_v33 = vrot.slane %v1947_v36, 9 }
  0x49   : > { %v561_v26 = vsel %vm2050_vm8, %v556_v24, %v560_v10  ;;  %v599_v49 = vsel %vm2050_vm8, %v594_v2, %v598_v12  ;;  %v604_v50 = vrot.slane %v603_v29, 4  ;;  %888 = vrot.lane.b32.xlu1 %v2129_v55, %s1804_s23  ;;  %v746_v35 = vrot.slane %v1958_v38, 5  ;;  %v2176_v38 = vld [vmem:[#allocation2 + $0x28] sm:$0xf] }
  0x4a   : > { %v2152_v25 = vcombine.low %v551_v40, %v561_v26  ;;  %v498_v30 = vrot.slane %v497_v18, 4  ;;  %v507_v34 = vor.u32 %v506_v21, %v502_v20  ;;  %v512_v53 = vrot.slane %v510_v22, 5 }
  0x4b   : > { %v609_v31 = vsel %vm2050_vm8, %v604_v50, %v608_v16  ;;  %v749_v9 = vrot.slane %v372_v3, 5  ;;  %v718_v54 = vrot.slane %v1978_v48, 5  ;;  %v748_v57 = vrot.slane %v746_v35, 4 }
  0x4c   : > { %666 = vrot.lane.b32.xlu0 %v2152_v25, %s1803_s15  ;;  %v2165_v36 = vcombine.low %v599_v49, %v609_v31  ;;  %v508_v43 = vrot.slane %v507_v34, 4  ;;  %v503_v51 = vsel %vm2050_vm8, %v498_v30, %v502_v20  ;;  %v2172_v58 = vcombine.low %v2156_v37, %v2158_v41  ;;  %v363_v49 = vld [vmem:[#allocation2 + $0x2c] sm:$0x1] }
  0x4d   : > { %v747_v48 = vsel %vm1996_vm7, %v1544_v33, %v746_v35  ;;  %v1540_v0 = vrot.slane %v1970_v46, 9  ;;  %v750_v3 = vsel %vm1996_vm7, %v748_v57, %v749_v9  ;;  %v611_v4 = vshrl.u32 %v2156_v37, 16 }
  0x4e   : > { %890 = vrot.lane.b32.xlu1 %v2165_v36, %s1804_s23  ;;  %v513_v61 = vsel %vm2050_vm8, %v508_v43, %v512_v53  ;;  %v614_v5 = vshll.u32 %v2156_v37, 16  ;;  %v624_v6 = vshrl.u32 %v2158_v41, 16  ;;  %438 = vst.msk [vmem:[#allocation3 + $0x38] sm:$0xff] %vm430_vm2, %v2172_v58  ;;  %v720_v7 = vrot.slane %v718_v54, 4 }
  0x4f   : > { %v2194_v47 = vcombine.low %v503_v51, %v513_v61  ;;  %v721_v46 = vrot.slane %v2133_v14, 5  ;;  %v2199_v8 = vcombine.low %v2174_v60, %v2176_v38  ;;  %v2203_v10 = vcombine.low %v747_v48, %v750_v3  ;;  %v375_v14 = vld [vmem:[#allocation2 + $0x5c] sm:$0x1]  ;;  %v1694_v61 = vld [vmem:[%s2521_s2] sm:$0xff]  }
  0x50   : > { %880 = vrot.lane.b32.xlu0 %v2104_v17, %s1804_s23  ;;  %v620_v17 = vshll.u32 %v2158_v41, 16  ;;  %v613_v59 = vrot.slane %v611_v4, 4  ;;  %v616_v11 = vrot.slane %v614_v5, 5  ;;  %v626_v39 = vrot.slane %v624_v6, 4  ;;  %1605 = vmatprep.subr.bf16.mxu0 %v1694_v61 }
  0x51   : > { %434 = vst.msk [vmem:[#allocation3 + $0x18] sm:$0xff] %vm430_vm2, %v2199_v8  ;;  %v719_v12 = vsel %vm1996_vm7, %v1540_v0, %v718_v54  ;;  %v722_v13 = vsel %vm1996_vm7, %v720_v7, %v721_v46  ;;  %v515_v15 = vshrl.u32 %v2174_v60, 16  ;;  %v518_v28 = vshll.u32 %v2174_v60, 16  ;;  %1627 = vmatprep.subr.bf16.mxu1 %v1694_v61  ;;  %1606 = vmatpush3.bf16.msra.mxu0 %v1694_v61  ;;  %v1696_v46 = vld [vmem:[%s2521_s2 + $0x10] ss:$0 sps:$4 sm:$0x33]  }
  0x52   : > { %932 = vrot.lane.b32.xlu1 %v2056_v32, %s1805_s24  ;;  %v622_v40 = vrot.slane %v620_v17, 5  ;;  %v528_v45 = vshrl.u32 %v2176_v38, 16  ;;  %v524_v24 = vshll.u32 %v2176_v38, 16  ;;  %v617_v2 = vor.u32 %v616_v11, %v613_v59  ;;  %1630 = vmatpush3.bf16.msra.mxu1 %v1694_v61 }
  0x53   : > { %v630_v16 = vshll.u32 %v375_v14, 16  ;;  %v2222_v18 = vcombine.low %v719_v12, %v722_v13  ;;  %v517_v20 = vrot.slane %v515_v15, 4  ;;  %v520_v21 = vrot.slane %v518_v28, 5  ;;  %v377_v12 = vld [vmem:[#allocation2 + $0x64] sm:$0xf] }
  0x54   : > { %882 = vrot.lane.b32.xlu0 %v2194_v47, %s1804_s23  ;;  %v627_v29 = vor.u32 %v626_v39, %v622_v40  ;;  %v526_v22 = vrot.slane %v524_v24, 5  ;;  %v530_v26 = vrot.slane %v528_v45, 4  ;;  %v618_v50 = vrot.slane %v617_v2, 4  ;;  %v376_v39 = vld [vmem:[#allocation2 + $0x60] sm:$0xf] }
  0x55   : > { %v632_v30 = vrot.slane %v630_v16, 5  ;;  %v521_v34 = vor.u32 %v520_v21, %v517_v20  ;;  %v753_v51 = vrot.slane %v2158_v41, 5  ;;  %v1545_v48 = vrot.slane %v2156_v37, 9  ;;  %v1695_v37 = vld [vmem:[%s2521_s2 + $0x8] sm:$0xff]  }
  0x56   : > { %934 = vrot.lane.b32.xlu1 %v2203_v10, %s1805_s24  ;;  %v628_v33 = vrot.slane %v627_v29, 4  ;;  %v531_v53 = vor.u32 %v530_v26, %v526_v22  ;;  %v623_v31 = vsel %vm2050_vm8, %v618_v50, %v622_v40  ;;  %v756_v41 = vrot.slane %v375_v14, 5  ;;  %1607 = vmatprep.subr.bf16.mxu0 %v1695_v37 }
  0x57   : > { %v755_v0 = vrot.slane %v753_v51, 4  ;;  %v1522_v3 = vcombine.low %v2007_v62, %v2018_v1  ;;  %v725_v5 = vrot.slane %v2176_v38, 5  ;;  %v754_v62 = vsel %vm1996_vm7, %v1545_v48, %v753_v51  ;;  %1628 = vmatprep.subr.bf16.mxu1 %v1695_v37  ;;  %1608 = vmatpush3.bf16.msra.mxu0 %v1695_v37  ;;  %v381_v48 = vld [vmem:[#allocation2 + $0x74] sm:$0x1] }
  0x58   : > { %924 = vrot.lane.b32.xlu0 %v2071_v42, %s1805_s24  ;;  %v534_v42 = vshll.u32 %v363_v49, 16  ;;  %v633_v35 = vsel %vm2050_vm8, %v628_v33, %v632_v30  ;;  %v532_v9 = vrot.slane %v531_v53, 4  ;;  %v1541_v38 = vrot.slane %v2174_v60, 9  ;;  %1631 = vmatpush3.bf16.msra.mxu1 %v1695_v37  ;;  %v379_v53 = vld [vmem:[#allocation2 + $0x6c] sm:$0xf] }
  0x59   : > { %v2238_v54 = vcombine.low %v623_v31, %v633_v35  ;;  %431 = vst.msk [vmem:[#allocation3] sm:$0xff] %vm430_vm2, %v1522_v3  ;;  %v757_v1 = vsel %vm1996_vm7, %v755_v0, %v756_v41  ;;  %v727_v6 = vrot.slane %v725_v5, 4  ;;  %v728_v7 = vrot.slane %v363_v49, 5  ;;  %1633 = vmatprep.subr.msk.bf16.mxu0 %vm1159_vm9, %v1696_v46  ;;  %1634 = vmatprep.subr.msk.bf16.mxu1 %vm1159_vm9, %v1696_v46 }
  0x5a   : > { %970 = vrot.lane.b32.xlu1 %v1967_v44, %s1806_s25  ;;  %v522_v44 = vrot.slane %v521_v34, 4  ;;  %v536_v43 = vrot.slane %v534_v42, 5  ;;  %v1553_v17 = vcombine.low %v754_v62, %v757_v1  ;;  %v1161_v59 = vsel %vm1159_vm9, %v1696_v46, 0  ;;  %v380_v42 = vld [vmem:[#allocation2 + $0x70] sm:$0xf] }
  0x5b   : > { %1610 = vmatpush3.bf16.msra.mxu0 %v1161_v59  ;;  %v726_v60 = vsel %vm1996_vm7, %v1541_v38, %v725_v5  ;;  %v729_v11 = vsel %vm1996_vm7, %v727_v6, %v728_v7  ;;  %v854_v13 = vshrl.u32 %v376_v39, 16  ;;  %v857_v14 = vshll.u32 %v376_v39, 16 }
  0x5c   : > { %926 = vrot.lane.b32.xlu0 %v2222_v18, %s1805_s24  ;;  %v527_v57 = vsel %vm2050_vm8, %v522_v44, %v526_v22  ;;  %1632 = vmatpush3.bf16.msra.mxu1 %v1161_v59  ;;  %v867_v40 = vshrl.u32 %v377_v12, 16  ;;  %v863_v15 = vshll.u32 %v377_v12, 16  ;;  %v916_v33 = vrot.slane %v377_v12, 5 }
  0x5d   : > { %v856_v28 = vrot.slane %v854_v13, 4  ;;  %v859_v45 = vrot.slane %v857_v14, 5  ;;  %v996_v35 = vshrl.u32 %v379_v53, 16  ;;  %v999_v44 = vshll.u32 %v379_v53, 16 }
  0x5e   : > { %972 = vrot.lane.b32.xlu1 %v2172_v58, %s1806_s25  ;;  %v865_v24 = vrot.slane %v863_v15, 5  ;;  %v869_v2 = vrot.slane %v867_v40, 4  ;;  %v918_v30 = vrot.slane %v916_v33, 4  ;;  %v1015_v3 = vshll.u32 %v381_v48, 16 }
  0x5f   : > { %v860_v29 = vor.u32 %v859_v45, %v856_v28  ;;  %v998_v51 = vrot.slane %v996_v35, 4  ;;  %v1058_v46 = vrot.slane %v380_v42, 5  ;;  %vm1046_vm0 = vcmask 261344  }
  0x60   : > { %962 = vrot.lane.b32.xlu0 %v1987_v52, %s1806_s25  ;;  %v537_v52 = vsel %vm2050_vm8, %v532_v9, %v536_v43  ;;  %v870_v16 = vor.u32 %v869_v2, %v865_v24  ;;  %v1009_v9 = vshrl.u32 %v380_v42, 16  ;;  %v1005_v43 = vshll.u32 %v380_v42, 16 }
  0x61   : > { %v2257_v4 = vcombine.low %v527_v57, %v537_v52  ;;  %v861_v21 = vrot.slane %v860_v29, 4  ;;  %v1001_v57 = vrot.slane %v999_v44, 5  ;;  %v1017_v62 = vrot.slane %v1015_v3, 5 }
  0x62   : > { %1030 = vrot.lane.b32.xlu1 %v2165_v36, %s1807_s26  ;;  %v871_v22 = vrot.slane %v870_v16, 4  ;;  %v1007_v52 = vrot.slane %v1005_v43, 5  ;;  %v1011_v61 = vrot.slane %v1009_v9, 4  ;;  %vm1090_vm1 = vcmask 294144  }
  0x63   : > { %v866_v49 = vsel %vm2050_vm8, %v861_v21, %v865_v24  ;;  %v1002_v0 = vor.u32 %v1001_v57, %v998_v51  ;;  %vm1134_vm2 = vcmask 293888  }
  0x64   : > { %964 = vrot.lane.b32.xlu0 %v2199_v8, %s1806_s25  ;;  %v1012_v41 = vor.u32 %v1011_v61, %v1007_v52 }
  0x65   : > { %v1003_v5 = vrot.slane %v1002_v0, 4 }
  0x66   : > { %1032 = vrot.lane.b32.xlu1 %v2238_v54, %s1807_s26  ;;  %v1013_v37 = vrot.slane %v1012_v41, 4 }
  0x67   : > { %v1008_v6 = vsel %vm2050_vm8, %v1003_v5, %v1007_v52 }
  0x68   : > { %1022 = vrot.lane.b32.xlu0 %v2194_v47, %s1807_s26  ;;  %v1018_v7 = vsel %vm2050_vm8, %v1013_v37, %v1017_v62 }
  0x6a   : > { %1074 = vrot.lane.b32.xlu1 %v2203_v10, %s1808_s5 }
  0x6c   : > { %1024 = vrot.lane.b32.xlu0 %v2257_v4, %s1807_s26 }
  0x6e   : > { %670 = vrot.lane.b32.xlu1 %v2165_v36, %s1803_s15  ;;  %v1549_v36 = vcombine.low %v726_v60, %v729_v11  ;;  %v1560_v60 = vrot.slane %v379_v53, 9  ;;  %v1060_v11 = vrot.slane %v1058_v46, 4 }
  0x70   : > { %1066 = vrot.lane.b32.xlu0 %v2222_v18, %s1808_s5  ;;  %v1059_v23 = vsel %vm1996_vm7, %v1560_v60, %v1058_v46 }
  0x72   : > { %1076 = vrot.lane.b32.xlu1 %v1553_v17, %s1808_s5 }
  0x74   : > { %662 = vrot.lane.b32.xlu0 %v2194_v47, %s1803_s15  ;;  %v378_v47 = vld [vmem:[#allocation2 + $0x68] sm:$0x1] }
  0x75   : > { %v873_v20 = vshll.u32 %v378_v47, 16  ;;  %v919_v34 = vrot.slane %v378_v47, 5 }
  0x76   : > { %672 = vrot.lane.b32.xlu1 %v2238_v54, %s1803_s15 }
  0x77   : > { %v875_v26 = vrot.slane %v873_v20, 5 }
  0x78   : > { %1068 = vrot.lane.b32.xlu0 %v1549_v36, %s1808_s5 }
  0x79   : > { %v876_v50 = vsel %vm2050_vm8, %v871_v22, %v875_v26 }
  0x7a   : > { %794 = vrot.lane.b32.xlu1 %v2203_v10, %s1802_s14  ;;  %v1554_v10 = vcombine.low %v376_v39, %v377_v12 }
  0x7c   : > { %664 = vrot.lane.b32.xlu0 %v2257_v4, %s1803_s15 }
  0x7e   : > { %796 = vrot.lane.b32.xlu1 %v1553_v17, %s1802_s14 }
  0x80   : > { %786 = vrot.lane.b32.xlu0 %v2222_v18, %s1802_s14  ;;  %v1556_v18 = vrot.slane %v376_v39, 9 }
  0x82   : > { %832 = vrot.lane.b32.xlu1 %v2172_v58, %s1801_s7  ;;  %v1555_v58 = vcombine.low %v866_v49, %v876_v50  ;;  %v917_v31 = vsel %vm1996_vm7, %v1556_v18, %v916_v33 }
  0x84   : > { %788 = vrot.lane.b32.xlu0 %v1549_v36, %s1802_s14  ;;  %s2457_s14 = scalar_lea.vmem %s2523_s4, %s1521_s13 }
  0x86   : > { %834 = vrot.lane.b32.xlu1 %v1554_v10, %s1801_s7 }
  0x88   : > { %824 = vrot.lane.b32.xlu0 %v2199_v8, %s1801_s7  ;;  %v920_v8 = vsel %vm1996_vm7, %v918_v30, %v919_v34 }
  0x8a   : > { %892 = vrot.lane.b32.xlu1 %v2238_v54, %s1804_s23  ;;  %v1557_v54 = vcombine.low %v917_v31, %v920_v8 }
  0x8c   : > { %826 = vrot.lane.b32.xlu0 %v2011_v63, %s1801_s7 }
  0x8e   : > { %894 = vrot.lane.b32.xlu1 %v1555_v58, %s1804_s23 }
  0x90   : > { %884 = vrot.lane.b32.xlu0 %v2257_v4, %s1804_s23  ;;  %v1558_v4 = vcombine.low %v379_v53, %v380_v42 }
  0x92   : > { %936 = vrot.lane.b32.xlu1 %v1553_v17, %s1805_s24  ;;  %v1559_v17 = vcombine.low %v1008_v6, %v1018_v7 }
  0x94   : > { %886 = vrot.lane.b32.xlu0 %v2152_v25, %s1804_s23 }
  0x96   : > { %938 = vrot.lane.b32.xlu1 %v1557_v54, %s1805_s24 }
  0x98   : > { %928 = vrot.lane.b32.xlu0 %v1549_v36, %s1805_s24  ;;  %v1061_v36 = vrot.slane %v381_v48, 5 }
  0x9a   : > { %974 = vrot.lane.b32.xlu1 %v1554_v10, %s1806_s25  ;;  %v1062_v12 = vsel %vm1996_vm7, %v1060_v11, %v1061_v36 }
  0x9b   : > { %v1561_v13 = vcombine.low %v1059_v23, %v1062_v12 }
  0x9c   : > { %930 = vrot.lane.b32.xlu0 %v2042_v19, %s1805_s24  ;;  %v829_v1 = vpop.permute.xlu1 %828 }
  0x9e   : > { %976 = vrot.lane.b32.xlu1 %v1558_v4, %s1806_s25  ;;  %v821_v38 = vpop.permute.xlu0 %820 }
  0xa0   : > { %966 = vrot.lane.b32.xlu0 %v2011_v63, %s1806_s25  ;;  %v831_v59 = vpop.permute.xlu1 %830 }
  0xa2   : > { %1034 = vrot.lane.b32.xlu1 %v1555_v58, %s1807_s26  ;;  %v823_v39 = vpop.permute.xlu0 %822 }
  0xa4   : > { %968 = vrot.lane.b32.xlu0 %v1934_v27, %s1806_s25 }
  0xa6   : > { %1036 = vrot.lane.b32.xlu1 %v1559_v17, %s1807_s26 }
  0xa8   : > { %1026 = vrot.lane.b32.xlu0 %v2152_v25, %s1807_s26  ;;  %v791_v63 = vpop.permute.xlu1 %790 }
  0xaa   : > { %1078 = vrot.lane.b32.xlu1 %v1557_v54, %s1808_s5 }
  0xab   : > { %v783_v14 = vpop.permute.xlu0 %782 }
  0xac   : > { %1028 = vrot.lane.b32.xlu0 %v2129_v55, %s1807_s26  ;;  %v793_v27 = vpop.permute.xlu1 %792 }
  0xae   : > { %1080 = vrot.lane.b32.xlu1 %v1561_v13, %s1808_s5 }
  0xaf   : > { %v785_v56 = vpop.permute.xlu0 %784 }
  0xb0   : > { %1070 = vrot.lane.b32.xlu0 %v2042_v19, %s1808_s5 }
  0xb1   : > { %v661_v40 = vpop.permute.xlu1 %660 }
  0xb2   : > { %684 = vst.msk [vmem:[#allocation3 + $0x8] sm:$0xff] %vm682_vm10, %v661_v40  ;;  %v2426_v40 = vld [vmem:[%s2522_s3] ss:$0 sm:$0xff] }
  0xb3   : > { %808 = vst.msk [vmem:[#allocation3 + $0x8] sm:$0xff] %vm806_vm11, %v785_v56 }
  0xb4   : > { %1072 = vrot.lane.b32.xlu0 %v2056_v32, %s1808_s5  ;;  %846 = vst.msk [vmem:[#allocation3 + $0x8] sm:$0xff] %vm844_vm12, %v823_v39 }
  0xb6   : > { %v659_v55 = vpop.permute.xlu0 %658 }
  0xb7   : > { %683 = vst.msk [vmem:[#allocation3] sm:$0xff] %vm682_vm10, %v659_v55  ;;  %v669_v25 = vpop.permute.xlu1 %668 }
  0xb8   : > { %807 = vst.msk [vmem:[#allocation3] sm:$0xff] %vm806_vm11, %v783_v14 }
  0xb9   : > { %688 = vst.msk [vmem:[#allocation3 + $0x28] sm:$0xff] %vm682_vm10, %v669_v25 }
  0xba   : > { %845 = vst.msk [vmem:[#allocation3] sm:$0xff] %vm844_vm12, %v821_v38 }
  0xbb   : > { %812 = vst.msk [vmem:[#allocation3 + $0x28] sm:$0xff] %vm806_vm11, %v793_v27  ;;  %v889_v19 = vpop.permute.xlu1 %888 }
  0xbc   : > { %850 = vst.msk [vmem:[#allocation3 + $0x28] sm:$0xff] %vm844_vm12, %v831_v59 }
  0xbe   : > { %v667_v15 = vpop.permute.xlu0 %666 }
  0xbf   : > { %687 = vst.msk [vmem:[#allocation3 + $0x20] sm:$0xff] %vm682_vm10, %v667_v15 }
  0xc0   : > { %811 = vst.msk [vmem:[#allocation3 + $0x20] sm:$0xff] %vm806_vm11, %v791_v63  ;;  %v891_v32 = vpop.permute.xlu1 %890 }
  0xc1   : > { %849 = vst.msk [vmem:[#allocation3 + $0x20] sm:$0xff] %vm844_vm12, %v829_v1 }
  0xc2   : > { %910 = vst.msk [vmem:[#allocation3 + $0x28] sm:$0xff] %vm904_vm13, %v891_v32  ;;  %909 = vst.msk [vmem:[#allocation3 + $0x20] sm:$0xff] %vm904_vm13, %v889_v19  ;;  %v881_v28 = vpop.permute.xlu0 %880 }
  0xc3   : > { %905 = vst.msk [vmem:[#allocation3] sm:$0xff] %vm904_vm13, %v881_v28 }
  0xc4   : > { %v933_v45 = vpop.permute.xlu1 %932 }
  0xc5   : > { %953 = vst.msk [vmem:[#allocation3 + $0x20] sm:$0xff] %vm948_vm14, %v933_v45 }
  0xc6   : > { %v883_v24 = vpop.permute.xlu0 %882 }
  0xc7   : > { %906 = vst.msk [vmem:[#allocation3 + $0x8] sm:$0xff] %vm904_vm13, %v883_v24 }
  0xc8   : > { %v935_v2 = vpop.permute.xlu1 %934 }
  0xc9   : > { %954 = vst.msk [vmem:[#allocation3 + $0x28] sm:$0xff] %vm948_vm14, %v935_v2 }
  0xca   : > { %v925_v47 = vpop.permute.xlu0 %924 }
  0xcb   : > { %949 = vst.msk [vmem:[#allocation3] sm:$0xff] %vm948_vm14, %v925_v47 }
  0xcc   : > { %v971_v29 = vpop.permute.xlu1 %970 }
  0xcd   : > { %991 = vst.msk [vmem:[#allocation3 + $0x20] sm:$0xff] %vm986_vm15, %v971_v29 }
  0xce   : > { %v927_v16 = vpop.permute.xlu0 %926 }
  0xcf   : > { %950 = vst.msk [vmem:[#allocation3 + $0x8] sm:$0xff] %vm948_vm14, %v927_v16 }
  0xd0   : > { %v973_v20 = vpop.permute.xlu1 %972 }
  0xd1   : > { %992 = vst.msk [vmem:[#allocation3 + $0x28] sm:$0xff] %vm986_vm15, %v973_v20 }
  0xd2   : > { %v963_v10 = vpop.permute.xlu0 %962 }
  0xd3   : > { %987 = vst.msk [vmem:[#allocation3] sm:$0xff] %vm986_vm15, %v963_v10 }
  0xd4   : > { %v1031_v21 = vpop.permute.xlu1 %1030 }
  0xd5   : > { %1051 = vst.msk [vmem:[#allocation3 + $0x20] sm:$0xff] %vm1046_vm0, %v1031_v21 }
  0xd6   : > { %v965_v22 = vpop.permute.xlu0 %964 }
  0xd7   : > { %988 = vst.msk [vmem:[#allocation3 + $0x8] sm:$0xff] %vm986_vm15, %v965_v22 }
  0xd8   : > { %v1033_v26 = vpop.permute.xlu1 %1032 }
  0xd9   : > { %1052 = vst.msk [vmem:[#allocation3 + $0x28] sm:$0xff] %vm1046_vm0, %v1033_v26 }
  0xda   : > { %v1023_v49 = vpop.permute.xlu0 %1022 }
  0xdb   : > { %1047 = vst.msk [vmem:[#allocation3] sm:$0xff] %vm1046_vm0, %v1023_v49 }
  0xdc   : > { %v1075_v50 = vpop.permute.xlu1 %1074 }
  0xdd   : > { %1095 = vst.msk [vmem:[#allocation3 + $0x20] sm:$0xff] %vm1090_vm1, %v1075_v50 }
  0xde   : > { %v1025_v33 = vpop.permute.xlu0 %1024 }
  0xdf   : > { %1048 = vst.msk [vmem:[#allocation3 + $0x8] sm:$0xff] %vm1046_vm0, %v1025_v33 }
  0xe0   : > { %v671_v58 = vpop.permute.xlu1 %670 }
  0xe1   : > { %689 = vst.msk [vmem:[#allocation3 + $0x30] sm:$0xff] %vm682_vm10, %v671_v58 }
  0xe2   : > { %v1067_v18 = vpop.permute.xlu0 %1066 }
  0xe3   : > { %1091 = vst.msk [vmem:[#allocation3] sm:$0xff] %vm1090_vm1, %v1067_v18 }
  0xe4   : > { %v1077_v30 = vpop.permute.xlu1 %1076  ;;  %v1103_v34 = vld [vmem:[#allocation3 + $0x20] sm:$0xff] }
  0xe5   : > { %1096 = vst.msk [vmem:[#allocation3 + $0x28] sm:$0xff] %vm1090_vm1, %v1077_v30  ;;  %1619 = vmatprep.mubr.msk.bf16.mxu1 %vm1134_vm2, %v1103_v34 }
  0xe6   : > { %v663_v53 = vpop.permute.xlu0 %662 }
  0xe7   : > { %685 = vst.msk [vmem:[#allocation3 + $0x10] sm:$0xff] %vm682_vm10, %v663_v53 }
  0xe8   : > { %v673_v42 = vpop.permute.xlu1 %672 }
  0xe9   : > { %690 = vst.msk [vmem:[#allocation3 + $0x38] sm:$0xff] %vm682_vm10, %v673_v42 }
  0xea   : > { %v1069_v31 = vpop.permute.xlu0 %1068  ;;  %v1099_v35 = vld [vmem:[#allocation3] sm:$0xff] }
  0xeb   : > { %1092 = vst.msk [vmem:[#allocation3 + $0x8] sm:$0xff] %vm1090_vm1, %v1069_v31  ;;  %1611 = vmatprep.mubr.msk.bf16.mxu0 %vm1134_vm2, %v1099_v35 }
  0xec   : > { %v795_v8 = vpop.permute.xlu1 %794  ;;  %v1104_v44 = vld [vmem:[#allocation3 + $0x28] sm:$0xff] }
  0xed   : > { %813 = vst.msk [vmem:[#allocation3 + $0x30] sm:$0xff] %vm806_vm11, %v795_v8  ;;  %1620 = vmatmul.mubr.msk.bf16.vlgmr.msra.gmra.mrb[0].mxu1 %vm1134_vm2, %v1104_v44 }
  0xee   : > { %v665_v9 = vpop.permute.xlu0 %664 }
  0xef   : > { %686 = vst.msk [vmem:[#allocation3 + $0x18] sm:$0xff] %vm682_vm10, %v665_v9 }
  0xf0   : > { %v797_v43 = vpop.permute.xlu1 %796 }
  0xf1   : > { %814 = vst.msk [vmem:[#allocation3 + $0x38] sm:$0xff] %vm806_vm11, %v797_v43 }
  0xf2   : > { %v787_v54 = vpop.permute.xlu0 %786  ;;  %v1100_v51 = vld [vmem:[#allocation3 + $0x8] sm:$0xff] }
  0xf3   : > { %809 = vst.msk [vmem:[#allocation3 + $0x10] sm:$0xff] %vm806_vm11, %v787_v54  ;;  %1612 = vmatmul.mubr.msk.bf16.vlgmr.msra.gmra.mrb[0].mxu0 %vm1134_vm2, %v1100_v51 }
  0xf4   : > { %v833_v57 = vpop.permute.xlu1 %832 }
  0xf5   : > { %851 = vst.msk [vmem:[#allocation3 + $0x30] sm:$0xff] %vm844_vm12, %v833_v57 }
  0xf6   : > { %v789_v52 = vpop.permute.xlu0 %788 }
  0xf7   : > { %810 = vst.msk [vmem:[#allocation3 + $0x18] sm:$0xff] %vm806_vm11, %v789_v52 }
  0xf8   : > { %v835_v61 = vpop.permute.xlu1 %834 }
  0xf9   : > { %852 = vst.msk [vmem:[#allocation3 + $0x38] sm:$0xff] %vm844_vm12, %v835_v61 }
  0xfa   : > { %v825_v48 = vpop.permute.xlu0 %824 }
  0xfb   : > { %847 = vst.msk [vmem:[#allocation3 + $0x10] sm:$0xff] %vm844_vm12, %v825_v48 }
  0xfc   : > { %v893_v0 = vpop.permute.xlu1 %892 }
  0xfd   : > { %911 = vst.msk [vmem:[#allocation3 + $0x30] sm:$0xff] %vm904_vm13, %v893_v0 }
  0xfe   : > { %v827_v41 = vpop.permute.xlu0 %826 }
  0xff   : > { %848 = vst.msk [vmem:[#allocation3 + $0x18] sm:$0xff] %vm844_vm12, %v827_v41 }
 0x100   : > { %v895_v3 = vpop.permute.xlu1 %894 }
 0x101   : > { %912 = vst.msk [vmem:[#allocation3 + $0x38] sm:$0xff] %vm904_vm13, %v895_v3 }
 0x102   : > { %v885_v4 = vpop.permute.xlu0 %884 }
 0x103   : > { %907 = vst.msk [vmem:[#allocation3 + $0x10] sm:$0xff] %vm904_vm13, %v885_v4 }
 0x104   : > { %v937_v5 = vpop.permute.xlu1 %936 }
 0x105   : > { %955 = vst.msk [vmem:[#allocation3 + $0x30] sm:$0xff] %vm948_vm14, %v937_v5 }
 0x106   : > { %v887_v37 = vpop.permute.xlu0 %886 }
 0x107   : > { %908 = vst.msk [vmem:[#allocation3 + $0x18] sm:$0xff] %vm904_vm13, %v887_v37 }
 0x108   : > { %v939_v62 = vpop.permute.xlu1 %938 }
 0x109   : > { %956 = vst.msk [vmem:[#allocation3 + $0x38] sm:$0xff] %vm948_vm14, %v939_v62 }
 0x10a   : > { %v929_v1 = vpop.permute.xlu0 %928 }
 0x10b   : > { %951 = vst.msk [vmem:[#allocation3 + $0x10] sm:$0xff] %vm948_vm14, %v929_v1 }
 0x10c   : > { %v975_v38 = vpop.permute.xlu1 %974 }
 0x10d   : > { %993 = vst.msk [vmem:[#allocation3 + $0x30] sm:$0xff] %vm986_vm15, %v975_v38 }
 0x10e   : > { %v931_v6 = vpop.permute.xlu0 %930 }
 0x10f   : > { %952 = vst.msk [vmem:[#allocation3 + $0x18] sm:$0xff] %vm948_vm14, %v931_v6 }
 0x110   : > { %v977_v7 = vpop.permute.xlu1 %976 }
 0x111   : > { %994 = vst.msk [vmem:[#allocation3 + $0x38] sm:$0xff] %vm986_vm15, %v977_v7 }
 0x112   : > { %v967_v46 = vpop.permute.xlu0 %966 }
 0x113   : > { %989 = vst.msk [vmem:[#allocation3 + $0x10] sm:$0xff] %vm986_vm15, %v967_v46 }
 0x114   : > { %v1035_v17 = vpop.permute.xlu1 %1034 }
 0x115   : > { %1053 = vst.msk [vmem:[#allocation3 + $0x30] sm:$0xff] %vm1046_vm0, %v1035_v17 }
 0x116   : > { %v969_v59 = vpop.permute.xlu0 %968 }
 0x117   : > { %990 = vst.msk [vmem:[#allocation3 + $0x18] sm:$0xff] %vm986_vm15, %v969_v59 }
 0x118   : > { %v1037_v60 = vpop.permute.xlu1 %1036 }
 0x119   : > { %1054 = vst.msk [vmem:[#allocation3 + $0x38] sm:$0xff] %vm1046_vm0, %v1037_v60 }
 0x11a   : > { %v1027_v11 = vpop.permute.xlu0 %1026 }
 0x11b   : > { %1049 = vst.msk [vmem:[#allocation3 + $0x10] sm:$0xff] %vm1046_vm0, %v1027_v11 }
 0x11c   : > { %v1079_v36 = vpop.permute.xlu1 %1078 }
 0x11d   : > { %1097 = vst.msk [vmem:[#allocation3 + $0x30] sm:$0xff] %vm1090_vm1, %v1079_v36 }
 0x11e   : > { %v1029_v39 = vpop.permute.xlu0 %1028 }
 0x11f   : > { %1050 = vst.msk [vmem:[#allocation3 + $0x18] sm:$0xff] %vm1046_vm0, %v1029_v39 }
 0x120   : > { %v1081_v23 = vpop.permute.xlu1 %1080 }
 0x121   : > { %1098 = vst.msk [vmem:[#allocation3 + $0x38] sm:$0xff] %vm1090_vm1, %v1081_v23 }
 0x122   : > { %v1071_v12 = vpop.permute.xlu0 %1070 }
 0x123   : > { %1093 = vst.msk [vmem:[#allocation3 + $0x10] sm:$0xff] %vm1090_vm1, %v1071_v12 }
 0x124   : > { %v1105_v63 = vld [vmem:[#allocation3 + $0x30] sm:$0xff] }
 0x125   : > { %1623 = vmatprep.mubr.msk.bf16.mxu1 %vm1134_vm2, %v1105_v63 }
 0x126   : > { %v1073_v13 = vpop.permute.xlu0 %1072 }
 0x127   : > { %1094 = vst.msk [vmem:[#allocation3 + $0x18] sm:$0xff] %vm1090_vm1, %v1073_v13 }
 0x128   : > { %v1106_v14 = vld [vmem:[#allocation3 + $0x38] sm:$0xff] }
 0x129   : > { %1624 = vmatmul.mubr.msk.bf16.gmra.mrb[4].mxu1 %vm1134_vm2, %v1106_v14 }
 0x12a   : > { %v1101_v27 = vld [vmem:[#allocation3 + $0x10] sm:$0xff] }
 0x12b   : > { %1615 = vmatprep.mubr.msk.bf16.mxu0 %vm1134_vm2, %v1101_v27 }
 0x12e   : > { %v1102_v56 = vld [vmem:[#allocation3 + $0x18] sm:$0xff] }
 0x12f   : > { %1616 = vmatmul.mubr.msk.bf16.gmra.mrb[4].mxu0 %vm1134_vm2, %v1102_v56 }
 0x1c0   : > { %v1621_v55 = vpop.f32.mrb[0].mxu1 }
 0x1c1   : > { %v2429_v25 = vadd.f32 %v1621_v55, %v2426_v40  ;;  %v1229_v19 = vpop.f32.mrb[1].mxu1 }
 0x1c2   : > { %v2432_v15 = vadd.f32 %v2426_v40, %v1229_v19  ;;  %v1622_v32 = vpop.f32.mrb[2].mxu1 }
 0x1c3   : > { %v1584_v28 = vmul.f32 -1.442695, %v2429_v25  ;;  %v2436_v45 = vadd.f32 %v1622_v32, %v2426_v40  ;;  %v1232_v24 = vpop.f32.mrb[3].mxu1 }
 0x1c4   : > { %v1582_v2 = vmul.f32 -1.442695, %v2432_v15  ;;  %v2440_v47 = vadd.f32 %v2426_v40, %v1232_v24 }
 0x1c5   : > { %1697 = vpow2.f32 %v1584_v28  ;;  %v1585_v29 = vmul.f32 -1.442695, %v2436_v45 }
 0x1c6   : > { %v1613_v16 = vpop.f32.mrb[0].mxu0  ;;  %1699 = vpow2.f32 %v1582_v2  ;;  %v1583_v20 = vmul.f32 -1.442695, %v2440_v47 }
 0x1c7   : > { %v2445_v10 = vadd.f32 %v1613_v16, %v2426_v40  ;;  %v1197_v21 = vpop.f32.mrb[1].mxu0  ;;  %1701 = vpow2.f32 %v1585_v29 }
 0x1c8   : > { %v1198_v22 = vadd.f32 %v2426_v40, %v1197_v21  ;;  %v1614_v26 = vpop.f32.mrb[2].mxu0  ;;  %1703 = vpow2.f32 %v1583_v20 }
 0x1c9   : > { %v1576_v49 = vmul.f32 -1.442695, %v2445_v10  ;;  %v1209_v50 = vadd.f32 %v1614_v26, %v2426_v40  ;;  %v1200_v33 = vpop.f32.mrb[3].mxu0 }
 0x1ca   : > { %v1574_v58 = vmul.f32 -1.442695, %v1198_v22  ;;  %v1201_v18 = vadd.f32 %v2426_v40, %v1200_v33 }
 0x1cb   : > { %1705 = vpow2.f32 %v1576_v49  ;;  %v1577_v30 = vmul.f32 -1.442695, %v1209_v50 }
 0x1cc   : > { %1707 = vpow2.f32 %v1574_v58  ;;  %v1575_v34 = vmul.f32 -1.442695, %v1201_v18 }
 0x1cd   : > { %1709 = vpow2.f32 %v1577_v30 }
 0x1ce   : > { %1711 = vpow2.f32 %v1575_v34 }
 0x1cf   : > { %v1698_v53 = vpop.eup %1697 }
 0x1d0   : > { %v1700_v42 = vpop.eup %1699  ;;  %v1318_v31 = vadd.f32 1.0, %v1698_v53 }
 0x1d1   : > { %v1702_v35 = vpop.eup %1701  ;;  %v1316_v8 = vadd.f32 1.0, %v1700_v42 }
 0x1d2   : > { %v1704_v44 = vpop.eup %1703  ;;  %1713 = vrcp.f32 %v1318_v31  ;;  %v1319_v9 = vadd.f32 1.0, %v1702_v35 }
 0x1d3   : > { %1715 = vrcp.f32 %v1316_v8  ;;  %v1317_v43 = vadd.f32 1.0, %v1704_v44 }
 0x1d4   : > { %1717 = vrcp.f32 %v1319_v9 }
 0x1d5   : > { %v1706_v54 = vpop.eup %1705  ;;  %1719 = vrcp.f32 %v1317_v43 }
 0x1d6   : > { %v1708_v51 = vpop.eup %1707  ;;  %v1310_v57 = vadd.f32 1.0, %v1706_v54 }
 0x1d7   : > { %v1710_v52 = vpop.eup %1709  ;;  %v1308_v61 = vadd.f32 1.0, %v1708_v51 }
 0x1d8   : > { %v1712_v48 = vpop.eup %1711  ;;  %1721 = vrcp.f32 %v1310_v57  ;;  %v1311_v0 = vadd.f32 1.0, %v1710_v52 }
 0x1d9   : > { %1723 = vrcp.f32 %v1308_v61  ;;  %v1309_v41 = vadd.f32 1.0, %v1712_v48 }
 0x1da   : > { %1725 = vrcp.f32 %v1311_v0 }
 0x1db   : > { %1727 = vrcp.f32 %v1309_v41 }
 0x1dc   : > { %v1714_v3 = vpop.eup %1713 }
 0x1dd   : > { %v1716_v4 = vpop.eup %1715  ;;  %v1366_v5 = vmul.f32 %v1714_v3, %v2429_v25 }
 0x1de   : > { %v1718_v37 = vpop.eup %1717  ;;  %v1364_v62 = vmul.f32 %v1716_v4, %v2432_v15 }
 0x1df   : > { %v1720_v1 = vpop.eup %1719  ;;  %1383 = vst.msk [vmem:[%s2457_s14 + $0x50] sm:$0xff] %vm1372_vm3, %v1366_v5  ;;  %v1367_v38 = vmul.f32 %v1718_v37, %v2436_v45 }
 0x1e0   : > { %1381 = vst.msk [vmem:[%s2457_s14 + $0x40] sm:$0xff] %vm1372_vm3, %v1364_v62  ;;  %v1365_v6 = vmul.f32 %v1720_v1, %v2440_v47 }
 0x1e1   : > { %1384 = vst.msk [vmem:[%s2457_s14 + $0x58] sm:$0xff] %vm1372_vm3, %v1367_v38 }
 0x1e2   : > { %v1722_v7 = vpop.eup %1721  ;;  %1382 = vst.msk [vmem:[%s2457_s14 + $0x48] sm:$0xff] %vm1372_vm3, %v1365_v6 }
 0x1e3   : > { %v1724_v46 = vpop.eup %1723  ;;  %v1358_v17 = vmul.f32 %v1722_v7, %v2445_v10 }
 0x1e4   : > { %v1726_v59 = vpop.eup %1725  ;;  %v1356_v60 = vmul.f32 %v1724_v46, %v1198_v22 }
 0x1e5   : > { %v1728_v11 = vpop.eup %1727  ;;  %1375 = vst.msk [vmem:[%s2457_s14 + $0x10] sm:$0xff] %vm1372_vm3, %v1358_v17  ;;  %v1359_v36 = vmul.f32 %v1726_v59, %v1209_v50 }
 0x1e6   : > { %1373 = vst.msk [vmem:[%s2457_s14] sm:$0xff] %vm1372_vm3, %v1356_v60  ;;  %v1357_v39 = vmul.f32 %v1728_v11, %v1201_v18 }
 0x1e7   : > { %1376 = vst.msk [vmem:[%s2457_s14 + $0x18] sm:$0xff] %vm1372_vm3, %v1359_v36 }
 0x1e8   : > { %1374 = vst.msk [vmem:[%s2457_s14 + $0x8] sm:$0xff] %vm1372_vm3, %v1357_v39 }
 0x1fc   : > { %v1625_v23 = vpop.f32.mrb[4].mxu1 }
 0x1fd   : > { %v1254_v12 = vadd.f32 %v1625_v23, %v2426_v40  ;;  %v1245_v63 = vpop.f32.mrb[5].mxu1 }
 0x1fe   : > { %v1246_v13 = vadd.f32 %v2426_v40, %v1245_v63  ;;  %v1626_v14 = vpop.f32.mrb[6].mxu1 }
 0x1ff   : > { %v1588_v27 = vmul.f32 -1.442695, %v1254_v12  ;;  %v1257_v56 = vadd.f32 %v1626_v14, %v2426_v40  ;;  %v1248_v55 = vpop.f32.mrb[7].mxu1 }
 0x200   : > { %v1586_v25 = vmul.f32 -1.442695, %v1246_v13  ;;  %v1249_v19 = vadd.f32 %v2426_v40, %v1248_v55 }
 0x201   : > { %1729 = vpow2.f32 %v1588_v27  ;;  %v1589_v15 = vmul.f32 -1.442695, %v1257_v56 }
 0x202   : > { %v1617_v32 = vpop.f32.mrb[4].mxu0  ;;  %1731 = vpow2.f32 %v1586_v25  ;;  %v1587_v28 = vmul.f32 -1.442695, %v1249_v19 }
 0x203   : > { %v1222_v45 = vadd.f32 %v1617_v32, %v2426_v40  ;;  %v1213_v24 = vpop.f32.mrb[5].mxu0  ;;  %1733 = vpow2.f32 %v1589_v15 }
 0x204   : > { %v1214_v2 = vadd.f32 %v2426_v40, %v1213_v24  ;;  %v1618_v47 = vpop.f32.mrb[6].mxu0  ;;  %1735 = vpow2.f32 %v1587_v28 }
 0x205   : > { %v1580_v29 = vmul.f32 -1.442695, %v1222_v45  ;;  %v1225_v16 = vadd.f32 %v1618_v47, %v2426_v40  ;;  %v1216_v20 = vpop.f32.mrb[7].mxu0 }
 0x206   : > { %v1578_v10 = vmul.f32 -1.442695, %v1214_v2  ;;  %v1217_v21 = vadd.f32 %v2426_v40, %v1216_v20 }
 0x207   : > { %1737 = vpow2.f32 %v1580_v29  ;;  %v1581_v22 = vmul.f32 -1.442695, %v1225_v16 }
 0x208   : > { %1739 = vpow2.f32 %v1578_v10  ;;  %v1579_v26 = vmul.f32 -1.442695, %v1217_v21 }
 0x209   : > { %1741 = vpow2.f32 %v1581_v22 }
 0x20a   : > { %1743 = vpow2.f32 %v1579_v26 }
 0x20b   : > { %v1730_v49 = vpop.eup %1729 }
 0x20c   : > { %v1732_v50 = vpop.eup %1731  ;;  %v1322_v33 = vadd.f32 1.0, %v1730_v49 }
 0x20d   : > { %v1734_v58 = vpop.eup %1733  ;;  %v1320_v18 = vadd.f32 1.0, %v1732_v50 }
 0x20e   : > { %v1736_v30 = vpop.eup %1735  ;;  %1745 = vrcp.f32 %v1322_v33  ;;  %v1323_v34 = vadd.f32 1.0, %v1734_v58 }
 0x20f   : > { %1747 = vrcp.f32 %v1320_v18  ;;  %v1321_v53 = vadd.f32 1.0, %v1736_v30 }
 0x210   : > { %1749 = vrcp.f32 %v1323_v34 }
 0x211   : > { %v1738_v42 = vpop.eup %1737  ;;  %1751 = vrcp.f32 %v1321_v53 }
 0x212   : > { %v1740_v40 = vpop.eup %1739  ;;  %v1314_v31 = vadd.f32 1.0, %v1738_v42 }
 0x213   : > { %v1742_v35 = vpop.eup %1741  ;;  %v1312_v8 = vadd.f32 1.0, %v1740_v40 }
 0x214   : > { %v1744_v44 = vpop.eup %1743  ;;  %1753 = vrcp.f32 %v1314_v31  ;;  %v1315_v9 = vadd.f32 1.0, %v1742_v35 }
 0x215   : > { %1755 = vrcp.f32 %v1312_v8  ;;  %v1313_v43 = vadd.f32 1.0, %v1744_v44 }
 0x216   : > { %1757 = vrcp.f32 %v1315_v9 }
 0x217   : > { %1759 = vrcp.f32 %v1313_v43 }
 0x218   : > { %v1746_v54 = vpop.eup %1745 }
 0x219   : > { %v1748_v51 = vpop.eup %1747  ;;  %v1370_v57 = vmul.f32 %v1746_v54, %v1254_v12 }
 0x21a   : > { %v1750_v52 = vpop.eup %1749  ;;  %v1368_v61 = vmul.f32 %v1748_v51, %v1246_v13 }
 0x21b   : > { %v1752_v48 = vpop.eup %1751  ;;  %1387 = vst.msk [vmem:[%s2457_s14 + $0x70] sm:$0xff] %vm1372_vm3, %v1370_v57  ;;  %v1371_v0 = vmul.f32 %v1750_v52, %v1257_v56 }
 0x21c   : > { %1385 = vst.msk [vmem:[%s2457_s14 + $0x60] sm:$0xff] %vm1372_vm3, %v1368_v61  ;;  %v1369_v41 = vmul.f32 %v1752_v48, %v1249_v19 }
 0x21d   : > { %1388 = vst.msk [vmem:[%s2457_s14 + $0x78] sm:$0xff] %vm1372_vm3, %v1371_v0 }
 0x21e   : > { %v1754_v3 = vpop.eup %1753  ;;  %1386 = vst.msk [vmem:[%s2457_s14 + $0x68] sm:$0xff] %vm1372_vm3, %v1369_v41 }
 0x21f   : > { %v1756_v4 = vpop.eup %1755  ;;  %v1362_v5 = vmul.f32 %v1754_v3, %v1222_v45 }
 0x220   : > { %v1758_v37 = vpop.eup %1757  ;;  %v1360_v62 = vmul.f32 %v1756_v4, %v1214_v2 }
 0x221   : > { %v1760_v1 = vpop.eup %1759  ;;  %1379 = vst.msk [vmem:[%s2457_s14 + $0x30] sm:$0xff] %vm1372_vm3, %v1362_v5  ;;  %v1363_v38 = vmul.f32 %v1758_v37, %v1225_v16 }
 0x222   : > { %1377 = vst.msk [vmem:[%s2457_s14 + $0x20] sm:$0xff] %vm1372_vm3, %v1360_v62  ;;  %v1361_v6 = vmul.f32 %v1760_v1, %v1217_v21 }
 0x223   : > { %1380 = vst.msk [vmem:[%s2457_s14 + $0x38] sm:$0xff] %vm1372_vm3, %v1363_v38 }
 0x224   : > { %1378 = vst.msk [vmem:[%s2457_s14 + $0x28] sm:$0xff] %vm1372_vm3, %v1361_v6 }
 0x225 PF: > { %s14_s19 = sadd.s32 1, %s1799_s19   ;;  %s2529_s15 = smov %s1791_s17 }
 0x226   : > { %p11_p9 = scmp.ge.s32.totalorder %s14_s19, 6   ;;  %s2530_s16 = smov %s1795_s18 }
 0x227   : > { %s2531_s17 = smov %s2534_s20  ;;  %s2532_s18 = smov %s2538_s21 }
 0x228   :  { %13 = sbr.rel (!%p11_p9) target bundleno = 3 (0x3), region = 70 }

</bundles_post_ra>
